<compile_context>
chip_gen: v6e
topology: v6e:2x2x1
jax: 0.10.0
libtpu: 0.0.40
codegen_flags: <defaults>
</compile_context>

<pallas_src>
import functools

import jax
import jax.numpy as jnp
from jax.experimental import pallas as pl
from jax.experimental.pallas import tpu as pltpu

FRAME = 128   # samples per frame (feature dim into the backbone MLP)
HIDDEN = 128  # hidden width
EMB = 128     # embedding dim


def _round_up(a, b):
    return ((a + b - 1) // b) * b


def _choose_tn(n_utt, nf):
    """Utterances per grid step (TN, a multiple of 8).

    Targets: TM = TN*NF in [512, 2048] rows (amortize ~0.35us/step, near HBM
    roofline) while giving the grid >= 4 steps when possible (v7x megacore
    sharding + DMA/compute overlap), never < 2 unless the batch is tiny.
    """
    n8 = _round_up(max(n_utt, 1), 8)
    nf = max(nf, 1)
    # Largest TN (multiple of 8) with TM <= 2048, clamped to the (padded) batch.
    tn = min(max(8, (2048 // nf) // 8 * 8), n8)

    def steps(t):
        return -(-n_utt // t)

    # Shrink for grid depth: prefer >= 4 steps, but keep TM >= 512 rows.
    while tn > 8 and steps(tn) < 4 and (tn // 2 // 8 * 8) * nf >= 512:
        tn = tn // 2 // 8 * 8
    # Guarantee at least 2 steps when the batch allows it.
    while tn > 8 and steps(tn) < 2:
        tn = max(8, tn // 2 // 8 * 8)
    return tn


def _speakernet_kernel(x_ref, w1_ref, b1_ref, w2_ref, b2_ref, w3_ref, b3_ref,
                       out_ref, *, tn, nf):
    # x_ref: (TM, FRAME) float32 — TM = tn*nf rows (tn whole utterances).
    # Cast to bf16 in-kernel (VPU, free slot) instead of a wrapper-side copy.
    x = x_ref[...].astype(jnp.bfloat16)

    # Frame-wise MLP on the MXU (bf16 operands, f32 accumulation).
    # Bias + ReLU + bf16 cast fused so spilled intermediates are stored as bf16.
    h = jnp.dot(x, w1_ref[...], preferred_element_type=jnp.float32)
    h = jnp.maximum(h + b1_ref[...], 0.0).astype(jnp.bfloat16)      # (TM, H)
    h = jnp.dot(h, w2_ref[...], preferred_element_type=jnp.float32)
    h = jnp.maximum(h + b2_ref[...], 0.0).astype(jnp.bfloat16)      # (TM, H)

    # Temporal sum-pool over frames: sublane (XLU) reduce, cost independent of TN.
    # Rows of a padded/garbage utterance only ever pool into that utterance's own
    # (discarded) output row — no cross-utterance contamination.
    pooled = jnp.sum(h.reshape(tn, nf, HIDDEN).astype(jnp.float32), axis=1)

    # Embedding projection; the 1/NF mean scale is pre-folded into w3.
    emb = jnp.dot(pooled.astype(jnp.bfloat16), w3_ref[...],
                  preferred_element_type=jnp.float32) + b3_ref[...]
    out_ref[...] = emb.astype(out_ref.dtype)


def speakernet_forward(data, params):
    """data: (..., T) float32, e.g. (batch, nPerSpeaker, T). Returns (N, EMB) f32."""
    w1, b1, w2, b2, w3, b3 = params

    # SpeakerNet.forward: data = data.reshape(-1, data.size()[-1])
    x = data.reshape(-1, data.shape[-1]).astype(jnp.float32)
    N, T = x.shape
    # TODO(synk): pad + masked mean for waveform lengths not multiple of FRAME.
    assert T % FRAME == 0, "waveform length must be a multiple of FRAME"
    NF = T // FRAME

    TN = _choose_tn(N, NF)            # utterances per grid step (multiple of 8)
    TM = TN * NF                      # rows per grid step
    num_tiles = pl.cdiv(N, TN)

    # Contiguous reshape only (free HBM view) — NO dtype cast, NO jnp.pad copy.
    # Boundary tiles (N % TN != 0) read garbage rows (discarded by masked output
    # writes) and write only the valid output rows.
    frames = x.reshape(N * NF, FRAME)

    w1b = w1.astype(jnp.bfloat16)
    w2b = w2.astype(jnp.bfloat16)
    # Fold the 1/NF mean scale into w3 at trace time (exact for power-of-two NF).
    w3b = (w3 * (1.0 / NF)).astype(jnp.bfloat16)

    const2 = lambda i: (0, 0)
    kernel = functools.partial(_speakernet_kernel, tn=TN, nf=NF)

    out = pl.pallas_call(
        kernel,
        out_shape=jax.ShapeDtypeStruct((N, EMB), jnp.float32),
        grid=(num_tiles,),
        in_specs=[
            pl.BlockSpec((TM, FRAME), lambda i: (i, 0)),        # activations (tiled, f32)
            pl.BlockSpec((FRAME, HIDDEN), const2),              # w1  (resident)
            pl.BlockSpec((1, HIDDEN), const2),                  # b1
            pl.BlockSpec((HIDDEN, HIDDEN), const2),             # w2
            pl.BlockSpec((1, HIDDEN), const2),                  # b2
            pl.BlockSpec((HIDDEN, EMB), const2),                # w3 (1/NF folded in)
            pl.BlockSpec((1, EMB), const2),                     # b3
        ],
        out_specs=pl.BlockSpec((TN, EMB), lambda i: (i, 0)),
        compiler_params=pltpu.CompilerParams(
            dimension_semantics=("parallel",),
            vmem_limit_bytes=32 * 1024 * 1024),
    )(frames, w1b, b1, w2b, b2, w3b, b3)

    return out


def speakernet_reference(data, params):
    """Pure-JAX reference mirroring the kernel's bf16/f32 mixed precision."""
    w1, b1, w2, b2, w3, b3 = params
    x = data.reshape(-1, data.shape[-1]).astype(jnp.float32)
    N, T = x.shape
    NF = T // FRAME
    xb = x.reshape(N * NF, FRAME).astype(jnp.bfloat16)
    h = jnp.maximum(jnp.dot(xb, w1.astype(jnp.bfloat16),
                            preferred_element_type=jnp.float32) + b1,
                    0.0).astype(jnp.bfloat16)
    h = jnp.maximum(jnp.dot(h, w2.astype(jnp.bfloat16),
                            preferred_element_type=jnp.float32) + b2,
                    0.0).astype(jnp.bfloat16)
    pooled = jnp.mean(h.astype(jnp.float32).reshape(N, NF, HIDDEN), axis=1)
    emb = jnp.dot(pooled.astype(jnp.bfloat16), w3.astype(jnp.bfloat16),
                  preferred_element_type=jnp.float32) + b3
    return emb


def init_params(key):
    k1, k2, k3 = jax.random.split(key, 3)
    s1 = 1.0 / jnp.sqrt(FRAME)
    s2 = 1.0 / jnp.sqrt(HIDDEN)
    w1 = jax.random.normal(k1, (FRAME, HIDDEN), jnp.float32) * s1
    b1 = jnp.zeros((1, HIDDEN), jnp.float32)
    w2 = jax.random.normal(k2, (HIDDEN, HIDDEN), jnp.float32) * s2
    b2 = jnp.zeros((1, HIDDEN), jnp.float32)
    w3 = jax.random.normal(k3, (HIDDEN, EMB), jnp.float32) * s2
    b3 = jnp.zeros((1, EMB), jnp.float32)
    return (w1, b1, w2, b2, w3, b3)


if __name__ == "__main__":
    key = jax.random.PRNGKey(0)
    pkey, dkey = jax.random.split(key)
    params = init_params(pkey)

    # (batch=8, nPerSpeaker=4, samples=4096) -> N=32 utterances, NF=32 frames.
    # _choose_tn picks TN=16 (TM=512 rows) -> a 2-step tiled, pipelined grid.
    data = jax.random.normal(dkey, (8, 4, 4096), jnp.float32)

    out = speakernet_forward(data, params)
    out = jax.block_until_ready(out)
    assert out.shape == (32, EMB), out.shape

    ref = jax.block_until_ready(speakernet_reference(data, params))
    assert jnp.all(jnp.isfinite(out))
    assert jnp.allclose(out, ref, rtol=2e-2, atol=2e-2), (
        float(jnp.max(jnp.abs(out - ref))))

    print("KERNEL_OK")
</pallas_src>

<mosaic_0001>
module attributes {stable_mosaic.version = 11 : i64} {
  func.func @_speakernet_kernel(%arg0: i32, %arg1: memref<512x128xf32, #tpu.memory_space<vmem>>, %arg2: memref<128x128xbf16, #tpu.memory_space<vmem>>, %arg3: memref<1x128xf32, #tpu.memory_space<vmem>>, %arg4: memref<128x128xbf16, #tpu.memory_space<vmem>>, %arg5: memref<1x128xf32, #tpu.memory_space<vmem>>, %arg6: memref<128x128xbf16, #tpu.memory_space<vmem>>, %arg7: memref<1x128xf32, #tpu.memory_space<vmem>>, %arg8: memref<16x128xf32, #tpu.memory_space<vmem>>) attributes {dimension_semantics = [#tpu.dimension_semantics<parallel>], iteration_bounds = array<i64: 2>, scalar_prefetch = 0 : i64, scratch_operands = 0 : i64, tpu.core_type = #tpu.core_type<tc>, window_params = [{transform_indices = @transform_0, window_bounds = array<i64: 512, 128>}, {pipeline_mode = #tpu.pipeline_mode<synchronous>, transform_indices = @transform_1, window_bounds = array<i64: 128, 128>}, {pipeline_mode = #tpu.pipeline_mode<synchronous>, transform_indices = @transform_2, window_bounds = array<i64: 1, 128>}, {pipeline_mode = #tpu.pipeline_mode<synchronous>, transform_indices = @transform_3, window_bounds = array<i64: 128, 128>}, {pipeline_mode = #tpu.pipeline_mode<synchronous>, transform_indices = @transform_4, window_bounds = array<i64: 1, 128>}, {pipeline_mode = #tpu.pipeline_mode<synchronous>, transform_indices = @transform_5, window_bounds = array<i64: 128, 128>}, {pipeline_mode = #tpu.pipeline_mode<synchronous>, transform_indices = @transform_6, window_bounds = array<i64: 1, 128>}, {transform_indices = @transform_7, window_bounds = array<i64: 16, 128>}]} {
    %c0 = arith.constant 0 : index
    %c0_0 = arith.constant 0 : index
    %0 = vector.load %arg1[%c0, %c0_0] : memref<512x128xf32, #tpu.memory_space<vmem>>, vector<512x128xf32>
    %1 = arith.truncf %0 : vector<512x128xf32> to vector<512x128xbf16>
    %c0_1 = arith.constant 0 : index
    %c0_2 = arith.constant 0 : index
    %2 = vector.load %arg2[%c0_1, %c0_2] : memref<128x128xbf16, #tpu.memory_space<vmem>>, vector<128x128xbf16>
    %cst = arith.constant dense<0.000000e+00> : vector<512x128xf32>
    %3 = tpu.matmul %1, %2, %cst {dimension_numbers = #tpu.dot_dimension_numbers<[1], [0], [0], [1], [0, 0, 1, 1], [], []>} : vector<512x128xbf16>, vector<128x128xbf16>, vector<512x128xf32> -> vector<512x128xf32>
    %c0_3 = arith.constant 0 : index
    %c0_4 = arith.constant 0 : index
    %4 = vector.load %arg3[%c0_3, %c0_4] : memref<1x128xf32, #tpu.memory_space<vmem>>, vector<1x128xf32>
    %5 = vector.broadcast %4 : vector<1x128xf32> to vector<512x128xf32>
    %6 = arith.addf %3, %5 : vector<512x128xf32>
    %cst_5 = arith.constant 0.000000e+00 : f32
    %7 = vector.broadcast %cst_5 : f32 to vector<512x128xf32>
    %8 = arith.maximumf %6, %7 : vector<512x128xf32>
    %9 = arith.truncf %8 : vector<512x128xf32> to vector<512x128xbf16>
    %c0_6 = arith.constant 0 : index
    %c0_7 = arith.constant 0 : index
    %10 = vector.load %arg4[%c0_6, %c0_7] : memref<128x128xbf16, #tpu.memory_space<vmem>>, vector<128x128xbf16>
    %cst_8 = arith.constant dense<0.000000e+00> : vector<512x128xf32>
    %11 = tpu.matmul %9, %10, %cst_8 {dimension_numbers = #tpu.dot_dimension_numbers<[1], [0], [0], [1], [0, 0, 1, 1], [], []>} : vector<512x128xbf16>, vector<128x128xbf16>, vector<512x128xf32> -> vector<512x128xf32>
    %c0_9 = arith.constant 0 : index
    %c0_10 = arith.constant 0 : index
    %12 = vector.load %arg5[%c0_9, %c0_10] : memref<1x128xf32, #tpu.memory_space<vmem>>, vector<1x128xf32>
    %13 = vector.broadcast %12 : vector<1x128xf32> to vector<512x128xf32>
    %14 = arith.addf %11, %13 : vector<512x128xf32>
    %cst_11 = arith.constant 0.000000e+00 : f32
    %15 = vector.broadcast %cst_11 : f32 to vector<512x128xf32>
    %16 = arith.maximumf %14, %15 : vector<512x128xf32>
    %17 = arith.truncf %16 : vector<512x128xf32> to vector<512x128xbf16>
    %18 = vector.shape_cast %17 : vector<512x128xbf16> to vector<16x32x128xbf16>
    %19 = arith.extf %18 : vector<16x32x128xbf16> to vector<16x32x128xf32>
    %cst_12 = arith.constant dense<0.000000e+00> : vector<16x128xf32>
    %20 = vector.multi_reduction <add>, %19, %cst_12 [1] : vector<16x32x128xf32> to vector<16x128xf32>
    %21 = arith.truncf %20 : vector<16x128xf32> to vector<16x128xbf16>
    %c0_13 = arith.constant 0 : index
    %c0_14 = arith.constant 0 : index
    %22 = vector.load %arg6[%c0_13, %c0_14] : memref<128x128xbf16, #tpu.memory_space<vmem>>, vector<128x128xbf16>
    %cst_15 = arith.constant dense<0.000000e+00> : vector<16x128xf32>
    %23 = tpu.matmul %21, %22, %cst_15 {dimension_numbers = #tpu.dot_dimension_numbers<[1], [0], [0], [1], [0, 0, 1, 1], [], []>} : vector<16x128xbf16>, vector<128x128xbf16>, vector<16x128xf32> -> vector<16x128xf32>
    %c0_16 = arith.constant 0 : index
    %c0_17 = arith.constant 0 : index
    %24 = vector.load %arg7[%c0_16, %c0_17] : memref<1x128xf32, #tpu.memory_space<vmem>>, vector<1x128xf32>
    %25 = vector.broadcast %24 : vector<1x128xf32> to vector<16x128xf32>
    %26 = arith.addf %23, %25 : vector<16x128xf32>
    %c0_18 = arith.constant 0 : index
    %c0_19 = arith.constant 0 : index
    %27 = vector.load %arg8[%c0_18, %c0_19] : memref<16x128xf32, #tpu.memory_space<vmem>>, vector<16x128xf32>
    tpu.vector_store %arg8[%c0_18, %c0_19], %26 {strides = array<i32>} : memref<16x128xf32, #tpu.memory_space<vmem>>, vector<16x128xf32>,
    return
  }
  func.func @transform_0(%arg0: i32) -> (i32, i32) {
    %c0_i32 = arith.constant 0 : i32
    %c0_i32_0 = arith.constant 0 : i32
    return %arg0, %c0_i32 : i32, i32
  }
  func.func @transform_1(%arg0: i32) -> (i32, i32) {
    %c0_i32 = arith.constant 0 : i32
    %c0_i32_0 = arith.constant 0 : i32
    %c0_i32_1 = arith.constant 0 : i32
    return %c0_i32, %c0_i32_0 : i32, i32
  }
  func.func @transform_2(%arg0: i32) -> (i32, i32) {
    %c0_i32 = arith.constant 0 : i32
    %c0_i32_0 = arith.constant 0 : i32
    %c0_i32_1 = arith.constant 0 : i32
    return %c0_i32, %c0_i32_0 : i32, i32
  }
  func.func @transform_3(%arg0: i32) -> (i32, i32) {
    %c0_i32 = arith.constant 0 : i32
    %c0_i32_0 = arith.constant 0 : i32
    %c0_i32_1 = arith.constant 0 : i32
    return %c0_i32, %c0_i32_0 : i32, i32
  }
  func.func @transform_4(%arg0: i32) -> (i32, i32) {
    %c0_i32 = arith.constant 0 : i32
    %c0_i32_0 = arith.constant 0 : i32
    %c0_i32_1 = arith.constant 0 : i32
    return %c0_i32, %c0_i32_0 : i32, i32
  }
  func.func @transform_5(%arg0: i32) -> (i32, i32) {
    %c0_i32 = arith.constant 0 : i32
    %c0_i32_0 = arith.constant 0 : i32
    %c0_i32_1 = arith.constant 0 : i32
    return %c0_i32, %c0_i32_0 : i32, i32
  }
  func.func @transform_6(%arg0: i32) -> (i32, i32) {
    %c0_i32 = arith.constant 0 : i32
    %c0_i32_0 = arith.constant 0 : i32
    %c0_i32_1 = arith.constant 0 : i32
    return %c0_i32, %c0_i32_0 : i32, i32
  }
  func.func @transform_7(%arg0: i32) -> (i32, i32) {
    %c0_i32 = arith.constant 0 : i32
    %c0_i32_0 = arith.constant 0 : i32
    return %arg0, %c0_i32 : i32, i32
  }
}

</mosaic_0001>

<bundles_post_ra>
// kernel: tpu_custom_call.1
= control target key start
LH: loop header
LB: loop body
LE: loop exit
PB: predicated region body
PF: predicated region fallthrough
CT: control target
= control target key end

     0   :  { %s2961_s0 = inlined_call_operand.hbm [shape: f32[1024,128], index: 0, kind: input, shape index: {}]   ;;  %s2962_s1 = inlined_call_operand.hbm [shape: bf16[128,128], index: 1, kind: input, shape index: {}]   ;;  %s2963_s2 = inlined_call_operand.vmem [shape: f32[1,128], index: 2, kind: input, shape index: {}]   ;;  %s2964_s3 = inlined_call_operand.hbm [shape: bf16[128,128], index: 3, kind: input, shape index: {}]   ;;  %s2965_s4 = inlined_call_operand.vmem [shape: f32[1,128], index: 4, kind: input, shape index: {}]   ;;  %s2966_s5 = inlined_call_operand.hbm [shape: bf16[128,128], index: 5, kind: input, shape index: {}]   ;;  %s2967_s6 = inlined_call_operand.vmem [shape: f32[1,128], index: 6, kind: input, shape index: {}]   ;;  %s2968_s7 = inlined_call_operand.hbm [shape: f32[32,128], index: 7, kind: output, shape index: {}]  }
   0x1   :  { %2973 = sst [smem:[#allocation15_spill]] %s2962_s1 }
   0x2   :  { %12 = vsyncpa [#allocation3], 0 }
   0x3   :  { %14 = vsyncpa [#allocation3 + $0x1], 0 }
   0x4   :  { %15 = vsyncpa [#allocation6], 0 }
   0x5   :  { %16 = vsyncpa [#allocation9], 0 }
   0x6   :  { %17 = vsyncpa [#allocation4], 0 }
   0x7   :  { %19 = vsyncpa [#allocation4 + $0x1], 0  ;;  %s2521_s24 = smov 0   ;;  %s2523_s25 = smov 0  }
   0x8   :  { %s2525_s26 = smov 0   ;;  %s2527_s27 = smov 0  }
   0x9 LB: > { %s2542_s28 = sadd.s32 4294967295, %s2466_s27   ;;  %s1861_s29 = sadd.s32 4294967294, %s2466_s27   ;;  %s2466_s27 = sphi %s2527_s27, %s2994_s27   ;;  %s2462_s26 = sphi %s2525_s26, %s2993_s26   ;;  %s2458_s25 = sphi %s2523_s25, %s2992_s25   ;;  %s2454_s24 = sphi %s2521_s24, %s2991_s24  }
   0xa   : > { %p45_p0 = scmp.ne.s32.totalorder %s2458_s25, %s2454_s24  ;;  %p2969_p1 = scmp.eq.s32.totalorder %s2542_s28, 0 }
   0xb   : > { %p201_p3 = scmp.eq.s32.totalorder %s1861_s29, 1  ;;  %p1862_p5 = scmp.ge.s32.totalorder %s2466_s27, 1 }
   0xc   : > { %p2551_p4 = por %p2969_p1, %p45_p0  ;;  %p208_p7 = scmp.lt.s32.totalorder %s2466_s27, 3 }
   0xd   : > { %p2556_p6 = por %p201_p3, %p45_p0  ;;  %s2468_s10 = smov [#allocation5]  }
   0xe   : > { %s2974_s30 = scalar_select %p2551_p4, 1, 0 }
   0xf   : > { %s2975_s8 = scalar_select %p2556_p6, 1, 0 }
  0x10   : > { %p2561_p8 = pnand %p1862_p5, %p208_p7  ;;  %s220_s11 = sshll.u32 %s2468_s10, 4  ;;  %s221_s11 = int_to_ptr.vmem [resolvable:$true] %s220_s11 }
  0x11   : > { %s2469_s13 = smov [#allocation7]   ;;  %s2470_s15 = smov [#allocation8]  }
  0x12   : > { %s2976_s9 = scalar_select %p2561_p8, 1, 0 }
  0x13   : > { %p2195_p9 = pneg %p2561_p8  ;;  %s236_s14 = sshll.u32 %s2469_s13, 4  ;;  %s237_s14 = int_to_ptr.vmem [resolvable:$true] %s236_s14 }
  0x14   : > { %s252_s16 = sshll.u32 %s2470_s15, 4  ;;  %s2299_s17 = scalar_lea.vmem %s221_s11, 1024  ;;  %s253_s16 = int_to_ptr.vmem [resolvable:$true] %s252_s16 }
  0x15   : > { %p2570_p11 = pnand %p2195_p9, %p2969_p1  ;;  %p2300_p13 = scmp.ne.s32.totalorder %s221_s11, %s2299_s17 }
  0x16   : > { %p2307_p5 = scmp.lt.s32.totalorder %s221_s11, %s221_s11  ;;  %p2308_p7 = scmp.lt.s32.totalorder %s2299_s17, %s2299_s17 }
  0x17   : > { %p2290_p12 = pneg %p2570_p11 }
  0x18   : > { %p2309_p9 = por %p2308_p7, %p2307_p5 }
  0x19   : > { %p2302_p0 = pnand %p2300_p13, %p2290_p12 }
  0x1b   : > { %p2303_p3 = pneg %p2302_p0 }
  0x1d   : > { %p2310_p10 = pnand %p2309_p9, %p2303_p3 }
  0x1f   : > { %2313 = shalt.err (!%p2310_p10)
}
  0x20   : > { %s2471_s18 = smov 64   ;;  %s2472_s19 = smov 4  }
  0x21   : > { %s2978_s1 = sld [smem:[#allocation15_spill]]  ;;  %s2325_s22 = scalar_lea.vmem %s237_s14, 1024 }
  0x22   : > { %p2326_p1 = scmp.ne.s32.totalorder %s237_s14, %s2325_s22  ;;  %p2333_p2 = scmp.lt.s32.totalorder %s237_s14, %s237_s14 }
  0x23   : > { %p2334_p6 = scmp.lt.s32.totalorder %s2325_s22, %s2325_s22 }
  0x24   : > { %p2328_p13 = pnand %p2326_p1, %p2290_p12 }
  0x25   : > { %p2335_p5 = por %p2334_p6, %p2333_p2 }
  0x26   : > { %p2329_p0 = pneg %p2328_p13 }
  0x27   : > { %2198 = dma.hbm_to_vmem [thread:$0]  (!%p2570_p11), %s2978_s1, 1024, %s221_s11, [#allocation6], %s2471_s18, %s2471_s18, %s2472_s19  }
  0x28   : > { %p2336_p3 = pnand %p2335_p5, %p2329_p0 }
  0x2a   : > { %2339 = shalt.err (!%p2336_p3)
}
  0x2b   : > { %2201 = dma.hbm_to_vmem [thread:$0]  (!%p2570_p11), %s2964_s3, 1024, %s237_s14, [#allocation6], %s2471_s18, %s2471_s18, %s2472_s19  }
  0x2c   : > { %s2351_s10 = scalar_lea.vmem %s253_s16, 1024  ;;  %p2359_p9 = scmp.lt.s32.totalorder %s253_s16, %s253_s16 }
  0x2d   : > { %p2352_p10 = scmp.ne.s32.totalorder %s253_s16, %s2351_s10  ;;  %p2360_p13 = scmp.lt.s32.totalorder %s2351_s10, %s2351_s10 }
  0x2f   : > { %p2354_p7 = pnand %p2352_p10, %p2290_p12  ;;  %p2361_p4 = por %p2360_p13, %p2359_p9 }
  0x31   : > { %p2355_p1 = pneg %p2354_p7 }
  0x33   : > { %p2362_p2 = pnand %p2361_p4, %p2355_p1 }
  0x35   : > { %2365 = shalt.err (!%p2362_p2)
}
  0x36   : > { %2204 = dma.hbm_to_vmem [thread:$0]  (!%p2570_p11), %s2966_s5, 1024, %s253_s16, [#allocation9], %s2471_s18, %s2471_s18, %s2472_s19  }
  0x37   : > { %s2601_s14 = sadd.s32 1, %s2466_s27   ;;  %s32_s12 = sadd.s32 1, %s2462_s26 }
  0x38   : > { %s29_s15 = ssub.s32 %s2466_s27, %s2601_s14  ;;  %p39_p6 = scmp.ne.s32.totalorder %s2462_s26, %s2458_s25 }
  0x39   : > { %p30_p4 = scmp.eq.s32.totalorder %s29_s15, 0  ;;  %p40_p12 = scmp.eq.s32.totalorder %s2466_s27, 0 }
  0x3a   : > { %p2216_p0 = scmp.lt.s32.totalorder %s2466_s27, 2  ;;  %p2979_p3 = scmp.eq.s32.totalorder %s2542_s28, 1 }
  0x3b   : > { %s2611_s17 = scalar_select %p30_p4, %s2462_s26, %s32_s12  }
  0x3c   : > { %p41_p5 = por %p40_p12, %p39_p6  ;;  %p2615_p10 = por %p2979_p3, %p39_p6 }
  0x3d   : > { %s269_s21 = sand.u32 1, %s2462_s26   ;;  %s1908_s22 = sshll.u32 %s2466_s27, 13 }
  0x3e   : > { %s2980_s20 = scalar_select %p2615_p10, 1, 0 }
  0x3f   : > { %s1867_s16 = sshll.u32 %s269_s21, 9  ;;  %s2624_s23 = scalar_lea.hbm %s2961_s0, %s1908_s22 }
  0x40   : > { %s273_s29 = scalar_lea.vmem [#allocation2], %s1867_s16  ;;  %p2626_p11 = pnand %p2216_p0, %p41_p5 }
  0x41   : > { %s280_s10 = sshll.u32 %s273_s29, 4  ;;  %s2632_s13 = scalar_lea.sflag [#allocation3], %s269_s21  ;;  %s2630_s10 = int_to_ptr.vmem [resolvable:$true] %s280_s10 }
  0x42   : > { %s2366_s15 = scalar_lea.hbm %s2624_s23, 8192  ;;  %p2368_p1 = pneg %p2626_p11 }
  0x43   : > { %p2367_p7 = scmp.ne.s32.totalorder %s2624_s23, %s2366_s15  ;;  %s2371_s16 = scalar_lea.hbm %s2961_s0, 16384 }
  0x44   : > { %p2372_p2 = scmp.lt.s32.totalorder %s2624_s23, %s2961_s0  ;;  %p2373_p4 = scmp.lt.s32.totalorder %s2371_s16, %s2366_s15 }
  0x45   : > { %p2369_p9 = pnand %p2368_p1, %p2367_p7 }
  0x46   : > { %p2374_p6 = por %p2373_p4, %p2372_p2 }
  0x47   : > { %p2370_p13 = pneg %p2369_p9 }
  0x49   : > { %p2375_p12 = pnand %p2374_p6, %p2370_p13 }
  0x4b   : > { %2378 = shalt.err (!%p2375_p12)
}
  0x4c   : > { %s2379_s21 = scalar_lea.vmem %s2630_s10, 8192  ;;  %s2473_s29 = smov [#allocation2]  }
  0x4d   : > { %p2380_p0 = scmp.ne.s32.totalorder %s2630_s10, %s2379_s21  ;;  %s2384_s1 = sshll.u32 %s2473_s29, 4  ;;  %s2385_s1 = int_to_ptr.vmem [resolvable:$false] %s2384_s1 }
  0x4e   : > { %s2386_s12 = scalar_lea.vmem %s2385_s1, 16384  ;;  %p2387_p7 = scmp.lt.s32.totalorder %s2630_s10, %s2385_s1 }
  0x4f   : > { %p2382_p5 = pnand %p2380_p0, %p2368_p1  ;;  %p2388_p9 = scmp.lt.s32.totalorder %s2386_s12, %s2379_s21 }
  0x51   : > { %p2383_p3 = pneg %p2382_p5  ;;  %p2389_p10 = por %p2388_p9, %p2387_p7 }
  0x53   : > { %p2390_p8 = pnand %p2389_p10, %p2383_p3 }
  0x55   : > { %2393 = shalt.err (!%p2390_p8)
}
  0x56   : > { %s2474_s15 = smov 128   ;;  %s2475_s22 = smov 8  }
  0x57   : > { %2208 = dma.hbm_to_vmem [thread:$0]  (!%p2626_p11), %s2624_s23, 8192, %s2630_s10, %s2632_s13, %s2474_s15, %s2474_s15, %s2475_s22  }
  0x58   : > { %p2982_p1 = scmp.ne.s32.totalorder %s2976_s9, 0 }
  0x59   : > { %s2656_s16 = sand.u32 (!%p2982_p1), 1, %s2458_s25   ;;  %p2983_p8 = scmp.ne.s32.totalorder (!%p2982_p1), %s2974_s30, 0 }
  0x5a   : > { %292 = sbr.rel (%p2982_p1) target bundleno = 906 (0x38a), region = 48  ;;  %s1871_s1 = sshll.u32 (!%p2982_p1), %s2656_s16, 9 }
  0x5b   : > { %s295_s18 = scalar_lea.sflag (!%p2982_p1), [#allocation3], %s2656_s16  ;;  %s2660_s19 = scalar_lea.vmem (!%p2982_p1), [#allocation2], %s1871_s1 }
  0x5f   : > { %2437 = dma.done.wait (%p2983_p8), %s295_s18, 8192  }
  0x60   : > { %2439 = vsyncadd (%p2983_p8), %s295_s18, 4294959104  ;;  %p2984_p10 = scmp.eq.s32.totalorder %s2542_s28, 0 }
  0x62   : > { %2441 = dma.done.wait (%p2984_p10), [#allocation6], 2048   ;;  %p2985_p11 = pmov %p2984_p10 }
  0x63   : > { %p2986_p13 = pmov %p2984_p10 }
  0x64   : > { %2443 = vsyncadd (%p2985_p11), [#allocation6], 4294965248 }
  0x65   : > { %2445 = dma.done.wait (%p2986_p13), [#allocation9], 1024   ;;  %p2987_p2 = pmov %p2984_p10 }
  0x66   : > { %v2264_v0 = vld [vmem:[#allocation5 + $0x38] sm:$0xff]   ;;  %v2265_v1 = vld [vmem:[#allocation5 + $0x30] sm:$0xff]   ;;  %v2266_v2 = vld [vmem:[#allocation5 + $0x28] sm:$0xff]   ;;  %vm2477_vm0 = vmmov 0   ;;  %vm1631_vm1 = vcmask 1041409   ;;  %vm1633_vm2 = vcmask 1042434  }
  0x67   : > { %2447 = vsyncadd (%p2987_p2), [#allocation9], 4294966272  ;;  %1999 = vmatprep.subr.bf16.mxu0 %v2264_v0  ;;  %v2267_v3 = vld [vmem:[#allocation5 + $0x20] sm:$0xff]   ;;  %v345_v5 = vld [vmem:[%s2660_s19 + $0x8] sm:$0xff]  ;;  %vm1635_vm3 = vcmask 1043459   ;;  %vm1637_vm4 = vcmask 1044484  }
  0x68   : > { %2000 = vmatpush3.bf16.msra.mxu0 %v2264_v0  ;;  %v344_v4 = vld [vmem:[%s2660_s19] sm:$0xff]  ;;  %v2268_v7 = vld [vmem:[#allocation5 + $0x18] sm:$0xff]   ;;  %v2269_v8 = vld [vmem:[#allocation5 + $0x10] sm:$0xff]   ;;  %vm1639_vm5 = vcmask 1045509   ;;  %vm1641_vm6 = vcmask 1046534   ;;  %vm1643_vm7 = vcmask 1047559  }
  0x69   : > { %2001 = vmatprep.subr.bf16.mxu0 %v2265_v1  ;;  %v408_v6 = vpack.c.bf16 %v345_v5, %v344_v4  ;;  %v2270_v9 = vld [vmem:[#allocation5 + $0x8] sm:$0xff]   ;;  %v2271_v10 = vld [vmem:[#allocation5] sm:$0xff]   ;;  %v346_v11 = vld [vmem:[%s2660_s19 + $0x10] sm:$0xff]  ;;  %s1875_s11 = sshll.u32 %s2656_s16, 4  ;;  %s1909_s15 = sshll.u32 %s2542_s28, 8 }
  0x6a   : > { %v347_v12 = vld [vmem:[%s2660_s19 + $0x18] sm:$0xff]  ;;  %v348_v13 = vld [vmem:[%s2660_s19 + $0x20] sm:$0xff]  ;;  %v349_v14 = vld [vmem:[%s2660_s19 + $0x28] sm:$0xff]  ;;  %s340_s29 = scalar_lea.vmem [#allocation10], %s1875_s11  ;;  %s2918_s18 = scalar_lea.hbm %s2968_s7, %s1909_s15 }
  0x6b   : > { %2015 = vmatprep.mubr.bf16.mxu0 %v408_v6  ;;  %v409_v15 = vpack.c.bf16 %v347_v12, %v346_v11  ;;  %v2272_v16 = vld [vmem:[#allocation7 + $0x38] sm:$0xff]   ;;  %v410_v17 = vpack.c.bf16 %v349_v14, %v348_v13  ;;  %v2273_v18 = vld [vmem:[#allocation7 + $0x30] sm:$0xff]   ;;  %v352_v21 = vld [vmem:[%s2660_s19 + $0x40] sm:$0xff]  ;;  %s1759_s12 = sshll.u32 %s340_s29, 4  ;;  %p2988_p6 = scmp.ne.s32.totalorder %s2980_s20, 0  ;;  %s2913_s12 = int_to_ptr.vmem [resolvable:$true] %s1759_s12 }
  0x6c   : > { %2002 = vmatpush3.bf16.msra.mxu0 %v2265_v1  ;;  %2079 = vmatprep.subr.bf16.mxu1 %v2272_v16  ;;  %v350_v19 = vld [vmem:[%s2660_s19 + $0x30] sm:$0xff]  ;;  %v351_v20 = vld [vmem:[%s2660_s19 + $0x38] sm:$0xff]  ;;  %v353_v22 = vld [vmem:[%s2660_s19 + $0x48] sm:$0xff]  ;;  %s2394_s30 = scalar_lea.vmem %s2913_s12, 256  ;;  %s2478_s28 = smov [#allocation10]  }
  0x6d   : > { %2003 = vmatprep.subr.bf16.mxu0 %v2266_v2  ;;  %2080 = vmatpush3.bf16.msra.mxu1 %v2272_v16  ;;  %v2274_v23 = vld [vmem:[#allocation7 + $0x28] sm:$0xff]   ;;  %v2275_v24 = vld [vmem:[#allocation7 + $0x20] sm:$0xff]   ;;  %v411_v25 = vpack.c.bf16 %v351_v20, %v350_v19  ;;  %v412_v26 = vpack.c.bf16 %v353_v22, %v352_v21  ;;  %v2276_v27 = vld [vmem:[#allocation7 + $0x18] sm:$0xff]   ;;  %p2395_p4 = scmp.ne.s32.totalorder %s2913_s12, %s2394_s30  ;;  %s2398_s9 = sshll.u32 %s2478_s28, 4  ;;  %s2399_s9 = int_to_ptr.vmem [resolvable:$false] %s2398_s9 }
  0x6e   : > { %2081 = vmatprep.subr.bf16.mxu1 %v2273_v18  ;;  %v354_v28 = vld [vmem:[%s2660_s19 + $0x50] sm:$0xff]  ;;  %v355_v29 = vld [vmem:[%s2660_s19 + $0x58] sm:$0xff]  ;;  %v356_v30 = vld [vmem:[%s2660_s19 + $0x60] sm:$0xff]  ;;  %s2400_s23 = scalar_lea.vmem %s2399_s9, 512  ;;  %p2401_p5 = scmp.lt.s32.totalorder %s2913_s12, %s2399_s9 }
  0x6f   : > { %v357_v31 = vld [vmem:[%s2660_s19 + $0x68] sm:$0xff]  ;;  %v413_v32 = vpack.c.bf16 %v355_v29, %v354_v28  ;;  %v358_v34 = vld [vmem:[%s2660_s19 + $0x70] sm:$0xff]  ;;  %v359_v35 = vld [vmem:[%s2660_s19 + $0x78] sm:$0xff]  ;;  %p2396_p12 = pnand %p2395_p4, %p2988_p6  ;;  %p2402_p3 = scmp.lt.s32.totalorder %s2400_s23, %s2394_s30 }
  0x70   : > { %2004 = vmatpush3.bf16.msra.mxu0 %v2266_v2  ;;  %v414_v33 = vpack.c.bf16 %v357_v31, %v356_v30  ;;  %v360_v36 = vld [vmem:[%s2660_s19 + $0x80] sm:$0xff]  ;;  %v361_v37 = vld [vmem:[%s2660_s19 + $0x88] sm:$0xff]  ;;  %v415_v38 = vpack.c.bf16 %v359_v35, %v358_v34  ;;  %v362_v40 = vld [vmem:[%s2660_s19 + $0x90] sm:$0xff] }
  0x71   : > { %2005 = vmatprep.subr.bf16.mxu0 %v2267_v3  ;;  %2082 = vmatpush3.bf16.msra.mxu1 %v2273_v18  ;;  %v416_v39 = vpack.c.bf16 %v361_v37, %v360_v36  ;;  %v363_v41 = vld [vmem:[%s2660_s19 + $0x98] sm:$0xff]  ;;  %v364_v42 = vld [vmem:[%s2660_s19 + $0xa0] sm:$0xff]  ;;  %v365_v43 = vld [vmem:[%s2660_s19 + $0xa8] sm:$0xff]  ;;  %p2397_p0 = pneg %p2396_p12  ;;  %p2403_p7 = por %p2402_p3, %p2401_p5 }
  0x72   : > { %2083 = vmatprep.subr.bf16.mxu1 %v2274_v23  ;;  %v417_v44 = vpack.c.bf16 %v363_v41, %v362_v40  ;;  %v418_v45 = vpack.c.bf16 %v365_v43, %v364_v42  ;;  %v366_v46 = vld [vmem:[%s2660_s19 + $0xb0] sm:$0xff]  ;;  %v367_v47 = vld [vmem:[%s2660_s19 + $0xb8] sm:$0xff]  ;;  %v368_v48 = vld [vmem:[%s2660_s19 + $0xc0] sm:$0xff] }
  0x73   : > { %v369_v49 = vld [vmem:[%s2660_s19 + $0xc8] sm:$0xff]  ;;  %v419_v50 = vpack.c.bf16 %v367_v47, %v366_v46  ;;  %v370_v52 = vld [vmem:[%s2660_s19 + $0xd0] sm:$0xff]  ;;  %v371_v53 = vld [vmem:[%s2660_s19 + $0xd8] sm:$0xff]  ;;  %p2404_p9 = pnand %p2403_p7, %p2397_p0 }
  0x74   : > { %2006 = vmatpush3.bf16.msra.mxu0 %v2267_v3  ;;  %v420_v51 = vpack.c.bf16 %v369_v49, %v368_v48  ;;  %v372_v54 = vld [vmem:[%s2660_s19 + $0xe0] sm:$0xff]  ;;  %v373_v55 = vld [vmem:[%s2660_s19 + $0xe8] sm:$0xff]  ;;  %v421_v56 = vpack.c.bf16 %v371_v53, %v370_v52  ;;  %v374_v58 = vld [vmem:[%s2660_s19 + $0xf0] sm:$0xff] }
  0x75   : > { %2007 = vmatprep.subr.bf16.mxu0 %v2268_v7  ;;  %2084 = vmatpush3.bf16.msra.mxu1 %v2274_v23  ;;  %v422_v57 = vpack.c.bf16 %v373_v55, %v372_v54  ;;  %v375_v59 = vld [vmem:[%s2660_s19 + $0xf8] sm:$0xff]  ;;  %v376_v60 = vld [vmem:[%s2660_s19 + $0x100] sm:$0xff]  ;;  %v377_v61 = vld [vmem:[%s2660_s19 + $0x108] sm:$0xff] }
  0x76   : > { %2085 = vmatprep.subr.bf16.mxu1 %v2275_v24  ;;  %v423_v62 = vpack.c.bf16 %v375_v59, %v374_v58  ;;  %v424_v63 = vpack.c.bf16 %v377_v61, %v376_v60  ;;  %v378_v0 = vld [vmem:[%s2660_s19 + $0x110] sm:$0xff]  ;;  %v379_v1 = vld [vmem:[%s2660_s19 + $0x118] sm:$0xff]  ;;  %v380_v2 = vld [vmem:[%s2660_s19 + $0x120] sm:$0xff] }
  0x77   : > { %v381_v3 = vld [vmem:[%s2660_s19 + $0x128] sm:$0xff]  ;;  %v425_v4 = vpack.c.bf16 %v379_v1, %v378_v0  ;;  %v2277_v6 = vld [vmem:[#allocation7 + $0x10] sm:$0xff]   ;;  %v2279_v14 = vld [vmem:[#allocation7] sm:$0xff]  }
  0x78   : > { %2008 = vmatpush3.bf16.msra.mxu0 %v2268_v7  ;;  %v426_v5 = vpack.c.bf16 %v381_v3, %v380_v2  ;;  %v382_v7 = vld [vmem:[%s2660_s19 + $0x130] sm:$0xff]  ;;  %v2278_v12 = vld [vmem:[#allocation7 + $0x8] sm:$0xff]   ;;  %v387_v16 = vld [vmem:[%s2660_s19 + $0x158] sm:$0xff] }
  0x79   : > { %2009 = vmatprep.subr.bf16.mxu0 %v2269_v8  ;;  %2086 = vmatpush3.bf16.msra.mxu1 %v2275_v24  ;;  %v389_v18 = vld [vmem:[%s2660_s19 + $0x168] sm:$0xff]  ;;  %v390_v21 = vld [vmem:[%s2660_s19 + $0x170] sm:$0xff]  ;;  %v391_v22 = vld [vmem:[%s2660_s19 + $0x178] sm:$0xff] }
  0x7a   : > { %2087 = vmatprep.subr.bf16.mxu1 %v2276_v27  ;;  %v392_v23 = vld [vmem:[%s2660_s19 + $0x180] sm:$0xff]  ;;  %v393_v24 = vld [vmem:[%s2660_s19 + $0x188] sm:$0xff]  ;;  %v395_v28 = vld [vmem:[%s2660_s19 + $0x198] sm:$0xff] }
  0x7b   : > { %v396_v29 = vld [vmem:[%s2660_s19 + $0x1a0] sm:$0xff]  ;;  %v397_v30 = vld [vmem:[%s2660_s19 + $0x1a8] sm:$0xff]  ;;  %v399_v34 = vld [vmem:[%s2660_s19 + $0x1b8] sm:$0xff] }
  0x7c   : > { %2010 = vmatpush3.bf16.msra.mxu0 %v2269_v8  ;;  %v383_v8 = vld [vmem:[%s2660_s19 + $0x138] sm:$0xff]  ;;  %v400_v35 = vld [vmem:[%s2660_s19 + $0x1c0] sm:$0xff]  ;;  %v401_v36 = vld [vmem:[%s2660_s19 + $0x1c8] sm:$0xff] }
  0x7d   : > { %2011 = vmatprep.subr.bf16.mxu0 %v2270_v9  ;;  %2088 = vmatpush3.bf16.msra.mxu1 %v2276_v27  ;;  %v427_v11 = vpack.c.bf16 %v383_v8, %v382_v7  ;;  %v394_v27 = vld [vmem:[%s2660_s19 + $0x190] sm:$0xff]  ;;  %v403_v40 = vld [vmem:[%s2660_s19 + $0x1d8] sm:$0xff]  ;;  %v404_v41 = vld [vmem:[%s2660_s19 + $0x1e0] sm:$0xff] }
  0x7e   : > { %2089 = vmatprep.subr.bf16.mxu1 %v2277_v6  ;;  %v433_v31 = vpack.c.bf16 %v395_v28, %v394_v27  ;;  %v405_v42 = vld [vmem:[%s2660_s19 + $0x1e8] sm:$0xff]  ;;  %v407_v46 = vld [vmem:[%s2660_s19 + $0x1f8] sm:$0xff] }
  0x80   : > { %2012 = vmatpush3.bf16.msra.mxu0 %v2270_v9  ;;  %v384_v9 = vld [vmem:[%s2660_s19 + $0x140] sm:$0xff] }
  0x81   : > { %2013 = vmatprep.subr.bf16.mxu0 %v2271_v10  ;;  %2090 = vmatpush3.bf16.msra.mxu1 %v2277_v6 }
  0x82   : > { %2091 = vmatprep.subr.bf16.mxu1 %v2278_v12 }
  0x84   : > { %2014 = vmatpush3.bf16.msra.mxu0 %v2271_v10  ;;  %v385_v10 = vld [vmem:[%s2660_s19 + $0x148] sm:$0xff] }
  0x85   : > { %v428_v13 = vpack.c.bf16 %v385_v10, %v384_v9  ;;  %2092 = vmatpush3.bf16.msra.mxu1 %v2278_v12 }
  0x86   : > { %2093 = vmatprep.subr.bf16.mxu1 %v2279_v14 }
  0x87   : > { %2016 = vmatmul.mubr.bf16.vlgmr.msra.gmra.mxu0 %v409_v15  ;;  %v386_v15 = vld [vmem:[%s2660_s19 + $0x150] sm:$0xff] }
  0x88   : > { %2019 = vmatprep.mubr.bf16.mxu0 %v410_v17  ;;  %v388_v17 = vld [vmem:[%s2660_s19 + $0x160] sm:$0xff]  ;;  %v429_v19 = vpack.c.bf16 %v387_v16, %v386_v15 }
  0x89   : > { %2094 = vmatpush3.bf16.msra.mxu1 %v2279_v14  ;;  %v430_v20 = vpack.c.bf16 %v389_v18, %v388_v17 }
  0x8f   : > { %2020 = vmatmul.mubr.bf16.gmra.mxu0 %v411_v25  ;;  %v431_v25 = vpack.c.bf16 %v391_v22, %v390_v21 }
  0x90   : > { %2023 = vmatprep.mubr.bf16.mxu0 %v412_v26  ;;  %v432_v26 = vpack.c.bf16 %v393_v24, %v392_v23 }
  0x97   : > { %2024 = vmatmul.mubr.bf16.gmra.mxu0 %v413_v32  ;;  %v434_v32 = vpack.c.bf16 %v397_v30, %v396_v29 }
  0x98   : > { %2027 = vmatprep.mubr.bf16.mxu0 %v414_v33  ;;  %v398_v33 = vld [vmem:[%s2660_s19 + $0x1b0] sm:$0xff] }
  0x99   : > { %v435_v37 = vpack.c.bf16 %v399_v34, %v398_v33 }
  0x9f   : > { %2028 = vmatmul.mubr.bf16.gmra.mxu0 %v415_v38  ;;  %v436_v38 = vpack.c.bf16 %v401_v36, %v400_v35 }
  0xa0   : > { %2031 = vmatprep.mubr.bf16.mxu0 %v416_v39  ;;  %v402_v39 = vld [vmem:[%s2660_s19 + $0x1d0] sm:$0xff] }
  0xa1   : > { %v437_v43 = vpack.c.bf16 %v403_v40, %v402_v39 }
  0xa7   : > { %2032 = vmatmul.mubr.bf16.gmra.mxu0 %v417_v44  ;;  %v438_v44 = vpack.c.bf16 %v405_v42, %v404_v41 }
  0xa8   : > { %2035 = vmatprep.mubr.bf16.mxu0 %v418_v45  ;;  %v406_v45 = vld [vmem:[%s2660_s19 + $0x1f0] sm:$0xff]  ;;  %s1746_s19 = scalar_lea.sflag [#allocation4], %s2656_s16 }
  0xa9   : > { %v439_v47 = vpack.c.bf16 %v407_v46, %v406_v45 }
  0xaf   : > { %2036 = vmatmul.mubr.bf16.gmra.mxu0 %v419_v50  ;;  %v2741_v50 = vld [vmem:[%s2963_s2] ss:$0 sm:$0xff] }
  0xb0   : > { %2039 = vmatprep.mubr.bf16.mxu0 %v420_v51 }
  0xb7   : > { %2040 = vmatmul.mubr.bf16.gmra.mxu0 %v421_v56 }
  0xb8   : > { %2043 = vmatprep.mubr.bf16.mxu0 %v422_v57 }
  0xbf   : > { %2044 = vmatmul.mubr.bf16.gmra.mxu0 %v423_v62 }
  0xc0   : > { %2047 = vmatprep.mubr.bf16.mxu0 %v424_v63 }
  0xc7   : > { %2048 = vmatmul.mubr.bf16.gmra.mxu0 %v425_v4 }
  0xc8   : > { %2051 = vmatprep.mubr.bf16.mxu0 %v426_v5 }
  0xcf   : > { %2052 = vmatmul.mubr.bf16.gmra.mxu0 %v427_v11 }
  0xd0   : > { %2055 = vmatprep.mubr.bf16.mxu0 %v428_v13 }
  0xd7   : > { %2056 = vmatmul.mubr.bf16.gmra.mxu0 %v429_v19 }
  0xd8   : > { %2059 = vmatprep.mubr.bf16.mxu0 %v430_v20 }
  0xdf   : > { %2060 = vmatmul.mubr.bf16.gmra.mxu0 %v431_v25 }
  0xe0   : > { %2063 = vmatprep.mubr.bf16.mxu0 %v432_v26 }
  0xe7   : > { %2064 = vmatmul.mubr.bf16.gmra.mxu0 %v433_v31 }
  0xe8   : > { %2067 = vmatprep.mubr.bf16.mxu0 %v434_v32 }
  0xef   : > { %2068 = vmatmul.mubr.bf16.gmra.mxu0 %v435_v37 }
  0xf0   : > { %2071 = vmatprep.mubr.bf16.mxu0 %v436_v38 }
  0xf7   : > { %2072 = vmatmul.mubr.bf16.gmra.mxu0 %v437_v43 }
  0xf8   : > { %2075 = vmatprep.mubr.bf16.mxu0 %v438_v44 }
  0xff   : > { %2076 = vmatmul.mubr.bf16.gmra.mxu0 %v439_v47 }
 0x147   : > { %v2017_v48 = vpop.f32.mrf.mxu0 }
 0x148   : > { %v554_v54 = vadd.f32 %v2017_v48, %v2741_v50 }
 0x149   : > { %v545_v49 = vpop.f32.mrf.mxu0 }
 0x14a   : > { %v546_v52 = vadd.f32 %v2741_v50, %v545_v49  ;;  %v802_v61 = vmax.f32 %v554_v54, 0.0 }
 0x14b   : > { %v2018_v51 = vpop.f32.mrf.mxu0 }
 0x14c   : > { %v557_v53 = vadd.f32 %v2018_v51, %v2741_v50  ;;  %v800_v59 = vmax.f32 %v546_v52, 0.0 }
 0x14d   : > { %v548_v55 = vpop.f32.mrf.mxu0 }
 0x14e   : > { %v549_v56 = vadd.f32 %v2741_v50, %v548_v55  ;;  %v803_v57 = vmax.f32 %v557_v53, 0.0 }
 0x14f   : > { %v2021_v58 = vpop.f32.mrf.mxu0 }
 0x150   : > { %v801_v60 = vmax.f32 %v549_v56, 0.0  ;;  %v865_v0 = vpack.c.bf16 %v803_v57, %v802_v61  ;;  %v570_v4 = vadd.f32 %v2021_v58, %v2741_v50 }
 0x151   : > { %v561_v62 = vpop.f32.mrf.mxu0 }
 0x152   : > { %v864_v63 = vpack.c.bf16 %v801_v60, %v800_v59  ;;  %v562_v2 = vadd.f32 %v2741_v50, %v561_v62  ;;  %v806_v11 = vmax.f32 %v570_v4, 0.0 }
 0x153   : > { %v2022_v1 = vpop.f32.mrf.mxu0 }
 0x154   : > { %v573_v3 = vadd.f32 %v2022_v1, %v2741_v50  ;;  %2095 = vmatprep.mubr.bf16.mxu1 %v864_v63  ;;  %v804_v9 = vmax.f32 %v562_v2, 0.0 }
 0x155   : > { %v564_v5 = vpop.f32.mrf.mxu0  ;;  %2096 = vmatmul.mubr.bf16.vlgmr.msra.gmra.mxu1 %v865_v0 }
 0x156   : > { %v565_v6 = vadd.f32 %v2741_v50, %v564_v5  ;;  %v807_v7 = vmax.f32 %v573_v3, 0.0 }
 0x157   : > { %v2025_v8 = vpop.f32.mrf.mxu0 }
 0x158   : > { %v805_v10 = vmax.f32 %v565_v6, 0.0  ;;  %v867_v14 = vpack.c.bf16 %v807_v7, %v806_v11  ;;  %v586_v18 = vadd.f32 %v2025_v8, %v2741_v50 }
 0x159   : > { %v577_v12 = vpop.f32.mrf.mxu0 }
 0x15a   : > { %v866_v13 = vpack.c.bf16 %v805_v10, %v804_v9  ;;  %v578_v16 = vadd.f32 %v2741_v50, %v577_v12  ;;  %v810_v25 = vmax.f32 %v586_v18, 0.0 }
 0x15b   : > { %v2026_v15 = vpop.f32.mrf.mxu0 }
 0x15c   : > { %v589_v17 = vadd.f32 %v2026_v15, %v2741_v50  ;;  %2099 = vmatprep.mubr.bf16.mxu1 %v866_v13  ;;  %v808_v23 = vmax.f32 %v578_v16, 0.0 }
 0x15d   : > { %v580_v19 = vpop.f32.mrf.mxu0  ;;  %2100 = vmatmul.mubr.bf16.gmra.mxu1 %v867_v14 }
 0x15e   : > { %v581_v20 = vadd.f32 %v2741_v50, %v580_v19  ;;  %v811_v21 = vmax.f32 %v589_v17, 0.0 }
 0x15f   : > { %v2029_v22 = vpop.f32.mrf.mxu0 }
 0x160   : > { %v809_v24 = vmax.f32 %v581_v20, 0.0  ;;  %v869_v28 = vpack.c.bf16 %v811_v21, %v810_v25  ;;  %v602_v32 = vadd.f32 %v2029_v22, %v2741_v50 }
 0x161   : > { %v593_v26 = vpop.f32.mrf.mxu0 }
 0x162   : > { %v868_v27 = vpack.c.bf16 %v809_v24, %v808_v23  ;;  %v594_v30 = vadd.f32 %v2741_v50, %v593_v26  ;;  %v814_v39 = vmax.f32 %v602_v32, 0.0 }
 0x163   : > { %v2030_v29 = vpop.f32.mrf.mxu0 }
 0x164   : > { %v605_v31 = vadd.f32 %v2030_v29, %v2741_v50  ;;  %2103 = vmatprep.mubr.bf16.mxu1 %v868_v27  ;;  %v812_v37 = vmax.f32 %v594_v30, 0.0 }
 0x165   : > { %v596_v33 = vpop.f32.mrf.mxu0  ;;  %2104 = vmatmul.mubr.bf16.gmra.mxu1 %v869_v28 }
 0x166   : > { %v597_v34 = vadd.f32 %v2741_v50, %v596_v33  ;;  %v815_v35 = vmax.f32 %v605_v31, 0.0 }
 0x167   : > { %v2033_v36 = vpop.f32.mrf.mxu0 }
 0x168   : > { %v813_v38 = vmax.f32 %v597_v34, 0.0  ;;  %v871_v42 = vpack.c.bf16 %v815_v35, %v814_v39  ;;  %v618_v46 = vadd.f32 %v2033_v36, %v2741_v50 }
 0x169   : > { %v609_v40 = vpop.f32.mrf.mxu0 }
 0x16a   : > { %v870_v41 = vpack.c.bf16 %v813_v38, %v812_v37  ;;  %v610_v44 = vadd.f32 %v2741_v50, %v609_v40  ;;  %v818_v54 = vmax.f32 %v618_v46, 0.0 }
 0x16b   : > { %v2034_v43 = vpop.f32.mrf.mxu0 }
 0x16c   : > { %v621_v45 = vadd.f32 %v2034_v43, %v2741_v50  ;;  %2107 = vmatprep.mubr.bf16.mxu1 %v870_v41  ;;  %v816_v52 = vmax.f32 %v610_v44, 0.0 }
 0x16d   : > { %v612_v47 = vpop.f32.mrf.mxu0  ;;  %2108 = vmatmul.mubr.bf16.gmra.mxu1 %v871_v42 }
 0x16e   : > { %v613_v48 = vadd.f32 %v2741_v50, %v612_v47  ;;  %v819_v49 = vmax.f32 %v621_v45, 0.0 }
 0x16f   : > { %v2037_v51 = vpop.f32.mrf.mxu0 }
 0x170   : > { %v817_v53 = vmax.f32 %v613_v48, 0.0  ;;  %v873_v57 = vpack.c.bf16 %v819_v49, %v818_v54  ;;  %v634_v61 = vadd.f32 %v2037_v51, %v2741_v50 }
 0x171   : > { %v625_v55 = vpop.f32.mrf.mxu0 }
 0x172   : > { %v872_v56 = vpack.c.bf16 %v817_v53, %v816_v52  ;;  %v626_v59 = vadd.f32 %v2741_v50, %v625_v55  ;;  %v822_v4 = vmax.f32 %v634_v61, 0.0 }
 0x173   : > { %v2038_v58 = vpop.f32.mrf.mxu0 }
 0x174   : > { %v637_v60 = vadd.f32 %v2038_v58, %v2741_v50  ;;  %2111 = vmatprep.mubr.bf16.mxu1 %v872_v56  ;;  %v820_v2 = vmax.f32 %v626_v59, 0.0 }
 0x175   : > { %v628_v62 = vpop.f32.mrf.mxu0  ;;  %2112 = vmatmul.mubr.bf16.gmra.mxu1 %v873_v57 }
 0x176   : > { %v629_v63 = vadd.f32 %v2741_v50, %v628_v62  ;;  %v823_v0 = vmax.f32 %v637_v60, 0.0 }
 0x177   : > { %v2041_v1 = vpop.f32.mrf.mxu0 }
 0x178   : > { %v821_v3 = vmax.f32 %v629_v63, 0.0  ;;  %v875_v7 = vpack.c.bf16 %v823_v0, %v822_v4  ;;  %v650_v11 = vadd.f32 %v2041_v1, %v2741_v50 }
 0x179   : > { %v641_v5 = vpop.f32.mrf.mxu0 }
 0x17a   : > { %v874_v6 = vpack.c.bf16 %v821_v3, %v820_v2  ;;  %v642_v9 = vadd.f32 %v2741_v50, %v641_v5  ;;  %v826_v18 = vmax.f32 %v650_v11, 0.0 }
 0x17b   : > { %v2042_v8 = vpop.f32.mrf.mxu0 }
 0x17c   : > { %v653_v10 = vadd.f32 %v2042_v8, %v2741_v50  ;;  %2115 = vmatprep.mubr.bf16.mxu1 %v874_v6  ;;  %v824_v16 = vmax.f32 %v642_v9, 0.0 }
 0x17d   : > { %v644_v12 = vpop.f32.mrf.mxu0  ;;  %2116 = vmatmul.mubr.bf16.gmra.mxu1 %v875_v7 }
 0x17e   : > { %v645_v13 = vadd.f32 %v2741_v50, %v644_v12  ;;  %v827_v14 = vmax.f32 %v653_v10, 0.0 }
 0x17f   : > { %v2045_v15 = vpop.f32.mrf.mxu0 }
 0x180   : > { %v825_v17 = vmax.f32 %v645_v13, 0.0  ;;  %v877_v21 = vpack.c.bf16 %v827_v14, %v826_v18  ;;  %v666_v25 = vadd.f32 %v2045_v15, %v2741_v50 }
 0x181   : > { %v657_v19 = vpop.f32.mrf.mxu0 }
 0x182   : > { %v876_v20 = vpack.c.bf16 %v825_v17, %v824_v16  ;;  %v658_v23 = vadd.f32 %v2741_v50, %v657_v19  ;;  %v830_v32 = vmax.f32 %v666_v25, 0.0 }
 0x183   : > { %v2046_v22 = vpop.f32.mrf.mxu0 }
 0x184   : > { %v669_v24 = vadd.f32 %v2046_v22, %v2741_v50  ;;  %2119 = vmatprep.mubr.bf16.mxu1 %v876_v20  ;;  %v828_v30 = vmax.f32 %v658_v23, 0.0 }
 0x185   : > { %v660_v26 = vpop.f32.mrf.mxu0  ;;  %2120 = vmatmul.mubr.bf16.gmra.mxu1 %v877_v21 }
 0x186   : > { %v661_v27 = vadd.f32 %v2741_v50, %v660_v26  ;;  %v831_v28 = vmax.f32 %v669_v24, 0.0 }
 0x187   : > { %v2049_v29 = vpop.f32.mrf.mxu0 }
 0x188   : > { %v829_v31 = vmax.f32 %v661_v27, 0.0  ;;  %v879_v35 = vpack.c.bf16 %v831_v28, %v830_v32  ;;  %v682_v39 = vadd.f32 %v2049_v29, %v2741_v50 }
 0x189   : > { %v673_v33 = vpop.f32.mrf.mxu0 }
 0x18a   : > { %v878_v34 = vpack.c.bf16 %v829_v31, %v828_v30  ;;  %v674_v37 = vadd.f32 %v2741_v50, %v673_v33  ;;  %v834_v46 = vmax.f32 %v682_v39, 0.0 }
 0x18b   : > { %v2050_v36 = vpop.f32.mrf.mxu0 }
 0x18c   : > { %v685_v38 = vadd.f32 %v2050_v36, %v2741_v50  ;;  %2123 = vmatprep.mubr.bf16.mxu1 %v878_v34  ;;  %v832_v44 = vmax.f32 %v674_v37, 0.0 }
 0x18d   : > { %v676_v40 = vpop.f32.mrf.mxu0  ;;  %2124 = vmatmul.mubr.bf16.gmra.mxu1 %v879_v35 }
 0x18e   : > { %v677_v41 = vadd.f32 %v2741_v50, %v676_v40  ;;  %v835_v42 = vmax.f32 %v685_v38, 0.0 }
 0x18f   : > { %v2053_v43 = vpop.f32.mrf.mxu0 }
 0x190   : > { %v833_v45 = vmax.f32 %v677_v41, 0.0  ;;  %v881_v49 = vpack.c.bf16 %v835_v42, %v834_v46  ;;  %v698_v54 = vadd.f32 %v2053_v43, %v2741_v50 }
 0x191   : > { %v689_v47 = vpop.f32.mrf.mxu0 }
 0x192   : > { %v880_v48 = vpack.c.bf16 %v833_v45, %v832_v44  ;;  %v690_v52 = vadd.f32 %v2741_v50, %v689_v47  ;;  %v838_v61 = vmax.f32 %v698_v54, 0.0 }
 0x193   : > { %v2054_v51 = vpop.f32.mrf.mxu0 }
 0x194   : > { %v701_v53 = vadd.f32 %v2054_v51, %v2741_v50  ;;  %2127 = vmatprep.mubr.bf16.mxu1 %v880_v48  ;;  %v836_v59 = vmax.f32 %v690_v52, 0.0 }
 0x195   : > { %v692_v55 = vpop.f32.mrf.mxu0  ;;  %2128 = vmatmul.mubr.bf16.gmra.mxu1 %v881_v49 }
 0x196   : > { %v693_v56 = vadd.f32 %v2741_v50, %v692_v55  ;;  %v839_v57 = vmax.f32 %v701_v53, 0.0 }
 0x197   : > { %v2057_v58 = vpop.f32.mrf.mxu0 }
 0x198   : > { %v837_v60 = vmax.f32 %v693_v56, 0.0  ;;  %v883_v0 = vpack.c.bf16 %v839_v57, %v838_v61  ;;  %v714_v4 = vadd.f32 %v2057_v58, %v2741_v50 }
 0x199   : > { %v705_v62 = vpop.f32.mrf.mxu0 }
 0x19a   : > { %v882_v63 = vpack.c.bf16 %v837_v60, %v836_v59  ;;  %v706_v2 = vadd.f32 %v2741_v50, %v705_v62  ;;  %v842_v11 = vmax.f32 %v714_v4, 0.0 }
 0x19b   : > { %v2058_v1 = vpop.f32.mrf.mxu0 }
 0x19c   : > { %v717_v3 = vadd.f32 %v2058_v1, %v2741_v50  ;;  %2131 = vmatprep.mubr.bf16.mxu1 %v882_v63  ;;  %v840_v9 = vmax.f32 %v706_v2, 0.0 }
 0x19d   : > { %v708_v5 = vpop.f32.mrf.mxu0  ;;  %2132 = vmatmul.mubr.bf16.gmra.mxu1 %v883_v0 }
 0x19e   : > { %v709_v6 = vadd.f32 %v2741_v50, %v708_v5  ;;  %v843_v7 = vmax.f32 %v717_v3, 0.0 }
 0x19f   : > { %v2061_v8 = vpop.f32.mrf.mxu0 }
 0x1a0   : > { %v841_v10 = vmax.f32 %v709_v6, 0.0  ;;  %v885_v14 = vpack.c.bf16 %v843_v7, %v842_v11  ;;  %v730_v18 = vadd.f32 %v2061_v8, %v2741_v50 }
 0x1a1   : > { %v721_v12 = vpop.f32.mrf.mxu0 }
 0x1a2   : > { %v884_v13 = vpack.c.bf16 %v841_v10, %v840_v9  ;;  %v722_v16 = vadd.f32 %v2741_v50, %v721_v12  ;;  %v846_v25 = vmax.f32 %v730_v18, 0.0 }
 0x1a3   : > { %v2062_v15 = vpop.f32.mrf.mxu0 }
 0x1a4   : > { %v733_v17 = vadd.f32 %v2062_v15, %v2741_v50  ;;  %2135 = vmatprep.mubr.bf16.mxu1 %v884_v13  ;;  %v844_v23 = vmax.f32 %v722_v16, 0.0 }
 0x1a5   : > { %v724_v19 = vpop.f32.mrf.mxu0  ;;  %2136 = vmatmul.mubr.bf16.gmra.mxu1 %v885_v14 }
 0x1a6   : > { %v725_v20 = vadd.f32 %v2741_v50, %v724_v19  ;;  %v847_v21 = vmax.f32 %v733_v17, 0.0 }
 0x1a7   : > { %v2065_v22 = vpop.f32.mrf.mxu0 }
 0x1a8   : > { %v845_v24 = vmax.f32 %v725_v20, 0.0  ;;  %v887_v28 = vpack.c.bf16 %v847_v21, %v846_v25  ;;  %v746_v32 = vadd.f32 %v2065_v22, %v2741_v50  ;;  %v2280_v20 = vld [vmem:[#allocation8 + $0x38] sm:$0xff]   ;;  %v2476_v21 = vmov 0.0   ;;  %v2281_v22 = vld [vmem:[#allocation8 + $0x30] sm:$0xff]  }
 0x1a9   : > { %v737_v26 = vpop.f32.mrf.mxu0  ;;  %2159 = vmatprep.subr.bf16.mxu0 %v2476_v21  ;;  %2175 = vmatprep.mubr.msk.bf16.mxu0 %vm2477_vm0, %v2476_v21 }
 0x1aa   : > { %v886_v27 = vpack.c.bf16 %v845_v24, %v844_v23  ;;  %v738_v30 = vadd.f32 %v2741_v50, %v737_v26  ;;  %v850_v39 = vmax.f32 %v746_v32, 0.0  ;;  %2160 = vmatpush3.bf16.msra.mxu0 %v2280_v20  ;;  %v2283_v23 = vld [vmem:[#allocation8 + $0x20] sm:$0xff]   ;;  %v2284_v24 = vld [vmem:[#allocation8 + $0x18] sm:$0xff]  }
 0x1ab   : > { %v2066_v29 = vpop.f32.mrf.mxu0  ;;  %2161 = vmatprep.subr.bf16.mxu0 %v2476_v21  ;;  %v2816_v26 = vld [vmem:[%s2965_s4] ss:$0 sm:$0xff] }
 0x1ac   : > { %v749_v31 = vadd.f32 %v2066_v29, %v2741_v50  ;;  %2139 = vmatprep.mubr.bf16.mxu1 %v886_v27  ;;  %v848_v37 = vmax.f32 %v738_v30, 0.0 }
 0x1ad   : > { %v740_v33 = vpop.f32.mrf.mxu0  ;;  %2140 = vmatmul.mubr.bf16.gmra.mxu1 %v887_v28 }
 0x1ae   : > { %v741_v34 = vadd.f32 %v2741_v50, %v740_v33  ;;  %v851_v35 = vmax.f32 %v749_v31, 0.0  ;;  %2162 = vmatpush3.bf16.msra.mxu0 %v2281_v22 }
 0x1af   : > { %v2069_v36 = vpop.f32.mrf.mxu0  ;;  %2163 = vmatprep.subr.bf16.mxu0 %v2476_v21 }
 0x1b0   : > { %v849_v38 = vmax.f32 %v741_v34, 0.0  ;;  %v889_v42 = vpack.c.bf16 %v851_v35, %v850_v39  ;;  %v762_v46 = vadd.f32 %v2069_v36, %v2741_v50 }
 0x1b1   : > { %v753_v40 = vpop.f32.mrf.mxu0 }
 0x1b2   : > { %v888_v41 = vpack.c.bf16 %v849_v38, %v848_v37  ;;  %v754_v44 = vadd.f32 %v2741_v50, %v753_v40  ;;  %v854_v54 = vmax.f32 %v762_v46, 0.0 }
 0x1b3   : > { %v2070_v43 = vpop.f32.mrf.mxu0 }
 0x1b4   : > { %v765_v45 = vadd.f32 %v2070_v43, %v2741_v50  ;;  %2143 = vmatprep.mubr.bf16.mxu1 %v888_v41  ;;  %v852_v52 = vmax.f32 %v754_v44, 0.0  ;;  %v2285_v43 = vld [vmem:[#allocation8 + $0x10] sm:$0xff]  }
 0x1b5   : > { %v756_v47 = vpop.f32.mrf.mxu0  ;;  %2144 = vmatmul.mubr.bf16.gmra.mxu1 %v889_v42 }
 0x1b6   : > { %v757_v48 = vadd.f32 %v2741_v50, %v756_v47  ;;  %v855_v49 = vmax.f32 %v765_v45, 0.0 }
 0x1b7   : > { %v2073_v51 = vpop.f32.mrf.mxu0 }
 0x1b8   : > { %v853_v53 = vmax.f32 %v757_v48, 0.0  ;;  %v891_v57 = vpack.c.bf16 %v855_v49, %v854_v54  ;;  %v778_v61 = vadd.f32 %v2073_v51, %v2741_v50 }
 0x1b9   : > { %v769_v55 = vpop.f32.mrf.mxu0 }
 0x1ba   : > { %v890_v56 = vpack.c.bf16 %v853_v53, %v852_v52  ;;  %v770_v59 = vadd.f32 %v2741_v50, %v769_v55  ;;  %v858_v4 = vmax.f32 %v778_v61, 0.0 }
 0x1bb   : > { %v2074_v58 = vpop.f32.mrf.mxu0 }
 0x1bc   : > { %v781_v60 = vadd.f32 %v2074_v58, %v2741_v50  ;;  %2147 = vmatprep.mubr.bf16.mxu1 %v890_v56  ;;  %v856_v2 = vmax.f32 %v770_v59, 0.0 }
 0x1bd   : > { %v772_v62 = vpop.f32.mrf.mxu0  ;;  %2148 = vmatmul.mubr.bf16.gmra.mxu1 %v891_v57 }
 0x1be   : > { %v773_v63 = vadd.f32 %v2741_v50, %v772_v62  ;;  %v859_v0 = vmax.f32 %v781_v60, 0.0 }
 0x1bf   : > { %v2077_v1 = vpop.f32.mrf.mxu0 }
 0x1c0   : > { %v857_v3 = vmax.f32 %v773_v63, 0.0  ;;  %v893_v7 = vpack.c.bf16 %v859_v0, %v858_v4  ;;  %v794_v11 = vadd.f32 %v2077_v1, %v2741_v50 }
 0x1c1   : > { %v785_v5 = vpop.f32.mrf.mxu0 }
 0x1c2   : > { %v892_v6 = vpack.c.bf16 %v857_v3, %v856_v2  ;;  %v786_v9 = vadd.f32 %v2741_v50, %v785_v5  ;;  %v862_v17 = vmax.f32 %v794_v11, 0.0 }
 0x1c3   : > { %v2078_v8 = vpop.f32.mrf.mxu0 }
 0x1c4   : > { %v797_v10 = vadd.f32 %v2078_v8, %v2741_v50  ;;  %2151 = vmatprep.mubr.bf16.mxu1 %v892_v6  ;;  %v860_v15 = vmax.f32 %v786_v9, 0.0 }
 0x1c5   : > { %v788_v12 = vpop.f32.mrf.mxu0  ;;  %2152 = vmatmul.mubr.bf16.gmra.mxu1 %v893_v7 }
 0x1c6   : > { %v789_v13 = vadd.f32 %v2741_v50, %v788_v12  ;;  %v863_v14 = vmax.f32 %v797_v10, 0.0  ;;  %v2282_v50 = vld [vmem:[#allocation8 + $0x28] sm:$0xff]  }
 0x1c7   : > { %2164 = vmatpush3.bf16.msra.mxu0 %v2282_v50 }
 0x1c8   : > { %v861_v16 = vmax.f32 %v789_v13, 0.0  ;;  %v895_v19 = vpack.c.bf16 %v863_v14, %v862_v17  ;;  %2165 = vmatprep.subr.bf16.mxu0 %v2476_v21  ;;  %v2286_v17 = vld [vmem:[#allocation8 + $0x8] sm:$0xff]  }
 0x1ca   : > { %v894_v18 = vpack.c.bf16 %v861_v16, %v860_v15 }
 0x1cb   : > { %2166 = vmatpush3.bf16.msra.mxu0 %v2283_v23 }
 0x1cc   : > { %2155 = vmatprep.mubr.bf16.mxu1 %v894_v18  ;;  %2167 = vmatprep.subr.bf16.mxu0 %v2476_v21 }
 0x1cd   : > { %2156 = vmatmul.mubr.bf16.gmra.mxu1 %v895_v19 }
 0x1cf   : > { %2168 = vmatpush3.bf16.msra.mxu0 %v2284_v24  ;;  %v2287_v24 = vld [vmem:[#allocation8] sm:$0xff]  }
 0x1d0   : > { %2169 = vmatprep.subr.bf16.mxu0 %v2476_v21 }
 0x1d3   : > { %2170 = vmatpush3.bf16.msra.mxu0 %v2285_v43 }
 0x1d4   : > { %2171 = vmatprep.subr.bf16.mxu0 %v2476_v21 }
 0x1d7   : > { %2172 = vmatpush3.bf16.msra.mxu0 %v2286_v17 }
 0x1d8   : > { %2173 = vmatprep.subr.bf16.mxu0 %v2476_v21 }
 0x1db   : > { %2174 = vmatpush3.bf16.msra.mxu0 %v2287_v24 }
 0x215   : > { %v2097_v25 = vpop.f32.mrf.mxu1 }
 0x216   : > { %v1010_v28 = vadd.f32 %v2097_v25, %v2816_v26 }
 0x217   : > { %v1001_v27 = vpop.f32.mrf.mxu1 }
 0x218   : > { %v1002_v30 = vadd.f32 %v2816_v26, %v1001_v27  ;;  %v1258_v33 = vmax.f32 %v1010_v28, 0.0 }
 0x219   : > { %v2098_v29 = vpop.f32.mrf.mxu1 }
 0x21a   : > { %v1013_v31 = vadd.f32 %v2098_v29, %v2816_v26  ;;  %v1256_v37 = vmax.f32 %v1002_v30, 0.0 }
 0x21b   : > { %v1004_v32 = vpop.f32.mrf.mxu1 }
 0x21c   : > { %v1259_v34 = vmax.f32 %v1013_v31, 0.0  ;;  %v1005_v35 = vadd.f32 %v2816_v26, %v1004_v32 }
 0x21d   : > { %v2101_v36 = vpop.f32.mrf.mxu1 }
 0x21e   : > { %v1321_v38 = vpack.c.bf16 %v1259_v34, %v1258_v33  ;;  %v1257_v39 = vmax.f32 %v1005_v35, 0.0  ;;  %v1026_v42 = vadd.f32 %v2101_v36, %v2816_v26 }
 0x21f   : > { %v1017_v40 = vpop.f32.mrf.mxu1 }
 0x220   : > { %v1320_v41 = vpack.c.bf16 %v1257_v39, %v1256_v37  ;;  %v1018_v47 = vadd.f32 %v2816_v26, %v1017_v40  ;;  %v1354_v49 = vunpack.c.l.bf16 %v1321_v38  ;;  %v1262_v53 = vmax.f32 %v1026_v42, 0.0 }
 0x221   : > { %v2102_v44 = vpop.f32.mrf.mxu1  ;;  %v1355_v56 = vunpack.c.h.bf16 %v1321_v38 }
 0x222   : > { %v1352_v45 = vunpack.c.l.bf16 %v1320_v41  ;;  %v1353_v46 = vunpack.c.h.bf16 %v1320_v41  ;;  %v1029_v48 = vadd.f32 %v2102_v44, %v2816_v26  ;;  %v1260_v59 = vmax.f32 %v1018_v47, 0.0 }
 0x223   : > { %v1020_v51 = vpop.f32.mrf.mxu1 }
 0x224   : > { %v1416_v52 = vadd.f32 %v1353_v46, %v1352_v45  ;;  %v1263_v54 = vmax.f32 %v1029_v48, 0.0  ;;  %v1021_v55 = vadd.f32 %v2816_v26, %v1020_v51 }
 0x225   : > { %v2105_v57 = vpop.f32.mrf.mxu1 }
 0x226   : > { %v1417_v58 = vadd.f32 %v1416_v52, %v1354_v49  ;;  %v1323_v60 = vpack.c.bf16 %v1263_v54, %v1262_v53  ;;  %v1261_v61 = vmax.f32 %v1021_v55, 0.0  ;;  %v1042_v62 = vadd.f32 %v2105_v57, %v2816_v26 }
 0x227   : > { %v1033_v63 = vpop.f32.mrf.mxu1 }
 0x228   : > { %v1418_v0 = vadd.f32 %v1417_v58, %v1355_v56  ;;  %v1322_v1 = vpack.c.bf16 %v1261_v61, %v1260_v59  ;;  %v1358_v7 = vunpack.c.l.bf16 %v1323_v60  ;;  %v1266_v8 = vmax.f32 %v1042_v62, 0.0 }
 0x229   : > { %v2106_v2 = vpop.f32.mrf.mxu1  ;;  %v1034_v9 = vadd.f32 %v2816_v26, %v1033_v63  ;;  %v1359_v15 = vunpack.c.h.bf16 %v1323_v60 }
 0x22a   : > { %v1419_v3 = vrot.slane %v1418_v0, 4  ;;  %v1356_v4 = vunpack.c.l.bf16 %v1322_v1  ;;  %v1357_v5 = vunpack.c.h.bf16 %v1322_v1  ;;  %v1045_v6 = vadd.f32 %v2106_v2, %v2816_v26 }
 0x22b   : > { %v1036_v10 = vpop.f32.mrf.mxu1  ;;  %v1264_v50 = vmax.f32 %v1034_v9, 0.0 }
 0x22c   : > { %v1420_v11 = vadd.f32 %v1419_v3, %v1418_v0  ;;  %v1425_v12 = vadd.f32 %v1357_v5, %v1356_v4  ;;  %v1267_v13 = vmax.f32 %v1045_v6, 0.0  ;;  %v1037_v14 = vadd.f32 %v2816_v26, %v1036_v10 }
 0x22d   : > { %v2109_v16 = vpop.f32.mrf.mxu1 }
 0x22e   : > { %v1421_v18 = vrot.slane %v1420_v11, 2  ;;  %v1426_v19 = vadd.f32 %v1425_v12, %v1358_v7  ;;  %v1325_v20 = vpack.c.bf16 %v1267_v13, %v1266_v8  ;;  %v1265_v22 = vmax.f32 %v1037_v14, 0.0 }
 0x22f   : > { %v1049_v23 = vpop.f32.mrf.mxu1  ;;  %v1058_v28 = vadd.f32 %v2109_v16, %v2816_v26 }
 0x230   : > { %v1422_v25 = vadd.f32 %v1421_v18, %v1420_v11  ;;  %v1427_v27 = vadd.f32 %v1426_v19, %v1359_v15  ;;  %v1324_v29 = vpack.c.bf16 %v1265_v22, %v1264_v50  ;;  %v1050_v36 = vadd.f32 %v2816_v26, %v1049_v23 }
 0x231   : > { %v2110_v30 = vpop.f32.mrf.mxu1  ;;  %v1270_v39 = vmax.f32 %v1058_v28, 0.0  ;;  %v1362_v42 = vunpack.c.l.bf16 %v1325_v20  ;;  %v1363_v48 = vunpack.c.h.bf16 %v1325_v20 }
 0x232   : > { %v1428_v31 = vrot.slane %v1427_v27, 4  ;;  %v1061_v32 = vadd.f32 %v2110_v30, %v2816_v26  ;;  %v1423_v33 = vrot.slane %v1422_v25, 1  ;;  %v1360_v34 = vunpack.c.l.bf16 %v1324_v29 }
 0x233   : > { %v1361_v35 = vunpack.c.h.bf16 %v1324_v29  ;;  %v1052_v37 = vpop.f32.mrf.mxu1  ;;  %v1268_v51 = vmax.f32 %v1050_v36, 0.0 }
 0x234   : > { %v1429_v38 = vadd.f32 %v1428_v31, %v1427_v27  ;;  %v1271_v40 = vmax.f32 %v1061_v32, 0.0  ;;  %v1053_v41 = vadd.f32 %v2816_v26, %v1052_v37  ;;  %v1424_v47 = vadd.f32 %v1423_v33, %v1422_v25 }
 0x235   : > { %v1434_v43 = vadd.f32 %v1361_v35, %v1360_v34  ;;  %v2113_v21 = vpop.f32.mrf.mxu1 }
 0x236   : > { %v1430_v44 = vrot.slane %v1429_v38, 2  ;;  %v1327_v45 = vpack.c.bf16 %v1271_v40, %v1270_v39  ;;  %v1269_v46 = vmax.f32 %v1053_v41, 0.0  ;;  %v1074_v54 = vadd.f32 %v2113_v21, %v2816_v26 }
 0x237   : > { %v1435_v49 = vadd.f32 %v1434_v43, %v1362_v42  ;;  %v1065_v52 = vpop.f32.mrf.mxu1  ;;  %v1560_v61 = vpack.c.bf16 %v1424_v47, %v1424_v47 }
 0x238   : > { %v1431_v53 = vadd.f32 %v1430_v44, %v1429_v38  ;;  %v1326_v56 = vpack.c.bf16 %v1269_v46, %v1268_v51  ;;  %v1066_v59 = vadd.f32 %v2816_v26, %v1065_v52  ;;  %v1274_v3 = vmax.f32 %v1074_v54, 0.0 }
 0x239   : > { %v1436_v55 = vadd.f32 %v1435_v49, %v1363_v48  ;;  %v2114_v57 = vpop.f32.mrf.mxu1  ;;  %v1366_v7 = vunpack.c.l.bf16 %v1327_v45  ;;  %v1367_v15 = vunpack.c.h.bf16 %v1327_v45  ;;  %v1615_v18 = vunpack.c.l.b16 %v1560_v61 }
 0x23a   : > { %v1432_v58 = vrot.slane %v1431_v53, 1  ;;  %v1077_v60 = vadd.f32 %v2114_v57, %v2816_v26  ;;  %v1364_v63 = vunpack.c.l.bf16 %v1326_v56  ;;  %v1365_v0 = vunpack.c.h.bf16 %v1326_v56 }
 0x23b   : > { %v1437_v62 = vrot.slane %v1436_v55, 4  ;;  %v1068_v1 = vpop.f32.mrf.mxu1  ;;  %v1272_v11 = vmax.f32 %v1066_v59, 0.0 }
 0x23c   : > { %v1433_v2 = vadd.f32 %v1432_v58, %v1431_v53  ;;  %v1275_v4 = vmax.f32 %v1077_v60, 0.0  ;;  %v1069_v5 = vadd.f32 %v2816_v26, %v1068_v1  ;;  %v1443_v8 = vadd.f32 %v1365_v0, %v1364_v63 }
 0x23d   : > { %v1438_v6 = vadd.f32 %v1437_v62, %v1436_v55  ;;  %v2117_v9 = vpop.f32.mrf.mxu1 }
 0x23e   : > { %v1561_v10 = vpack.c.bf16 %v1433_v2, %v1433_v2  ;;  %v1329_v12 = vpack.c.bf16 %v1275_v4, %v1274_v3  ;;  %v1273_v13 = vmax.f32 %v1069_v5, 0.0  ;;  %v1444_v16 = vadd.f32 %v1443_v8, %v1366_v7 }
 0x23f   : > { %v1439_v14 = vrot.slane %v1438_v6, 2  ;;  %v1081_v17 = vpop.f32.mrf.mxu1  ;;  %v1090_v22 = vadd.f32 %v2117_v9, %v2816_v26 }
 0x240   : > { %v1616_v19 = vunpack.c.l.b16 %v1561_v10  ;;  %v1328_v20 = vpack.c.bf16 %v1273_v13, %v1272_v11  ;;  %v1445_v23 = vadd.f32 %v1444_v16, %v1367_v15  ;;  %v1082_v24 = vadd.f32 %v2816_v26, %v1081_v17 }
 0x241   : > { %v1440_v50 = vadd.f32 %v1439_v14, %v1438_v6  ;;  %v2118_v25 = vpop.f32.mrf.mxu1  ;;  %v1370_v33 = vunpack.c.l.bf16 %v1329_v12  ;;  %v1278_v36 = vmax.f32 %v1090_v22, 0.0  ;;  %v1371_v41 = vunpack.c.h.bf16 %v1329_v12 }
 0x242   : > { %v1632_v27 = vsel %vm1631_vm1, %v1616_v19, %v1615_v18  ;;  %v1368_v28 = vunpack.c.l.bf16 %v1328_v20  ;;  %v1369_v29 = vunpack.c.h.bf16 %v1328_v20  ;;  %v1093_v30 = vadd.f32 %v2118_v25, %v2816_v26 }
 0x243   : > { %v1441_v31 = vrot.slane %v1440_v50, 1  ;;  %v1446_v32 = vrot.slane %v1445_v23, 4  ;;  %v1084_v34 = vpop.f32.mrf.mxu1  ;;  %v1276_v21 = vmax.f32 %v1082_v24, 0.0 }
 0x244   : > { %v1452_v35 = vadd.f32 %v1369_v29, %v1368_v28  ;;  %v1279_v37 = vmax.f32 %v1093_v30, 0.0  ;;  %v1085_v38 = vadd.f32 %v2816_v26, %v1084_v34 }
 0x245   : > { %v1442_v39 = vadd.f32 %v1441_v31, %v1440_v50  ;;  %v1447_v40 = vadd.f32 %v1446_v32, %v1445_v23  ;;  %v2121_v42 = vpop.f32.mrf.mxu1 }
 0x246   : > { %v1453_v43 = vadd.f32 %v1452_v35, %v1370_v33  ;;  %v1331_v44 = vpack.c.bf16 %v1279_v37, %v1278_v36  ;;  %v1277_v45 = vmax.f32 %v1085_v38, 0.0  ;;  %v1106_v48 = vadd.f32 %v2121_v42, %v2816_v26 }
 0x247   : > { %v1562_v46 = vpack.c.bf16 %v1442_v39, %v1442_v39  ;;  %v1448_v47 = vrot.slane %v1447_v40, 2  ;;  %v1097_v49 = vpop.f32.mrf.mxu1 }
 0x248   : > { %v1454_v51 = vadd.f32 %v1453_v43, %v1371_v41  ;;  %v1330_v52 = vpack.c.bf16 %v1277_v45, %v1276_v21  ;;  %v1374_v55 = vunpack.c.l.bf16 %v1331_v44  ;;  %v1282_v63 = vmax.f32 %v1106_v48, 0.0 }
 0x249   : > { %v1617_v53 = vunpack.c.l.b16 %v1562_v46  ;;  %v1449_v54 = vadd.f32 %v1448_v47, %v1447_v40  ;;  %v2122_v56 = vpop.f32.mrf.mxu1  ;;  %v1098_v0 = vadd.f32 %v2816_v26, %v1097_v49  ;;  %v1375_v7 = vunpack.c.h.bf16 %v1331_v44 }
 0x24a   : > { %v1455_v57 = vrot.slane %v1454_v51, 4  ;;  %v1372_v58 = vunpack.c.l.bf16 %v1330_v52  ;;  %v1373_v59 = vunpack.c.h.bf16 %v1330_v52  ;;  %v1109_v60 = vadd.f32 %v2122_v56, %v2816_v26 }
 0x24b   : > { %v1634_v61 = vsel %vm1633_vm2, %v1617_v53, %v1632_v27  ;;  %v1450_v62 = vrot.slane %v1449_v54, 1  ;;  %v1100_v1 = vpop.f32.mrf.mxu1  ;;  %v1280_v14 = vmax.f32 %v1098_v0, 0.0 }
 0x24c   : > { %v1456_v2 = vadd.f32 %v1455_v57, %v1454_v51  ;;  %v1461_v3 = vadd.f32 %v1373_v59, %v1372_v58  ;;  %v1283_v4 = vmax.f32 %v1109_v60, 0.0  ;;  %v1101_v5 = vadd.f32 %v2816_v26, %v1100_v1 }
 0x24d   : > { %v1451_v6 = vadd.f32 %v1450_v62, %v1449_v54  ;;  %v2125_v8 = vpop.f32.mrf.mxu1 }
 0x24e   : > { %v1457_v9 = vrot.slane %v1456_v2, 2  ;;  %v1462_v10 = vadd.f32 %v1461_v3, %v1374_v55  ;;  %v1333_v11 = vpack.c.bf16 %v1283_v4, %v1282_v63  ;;  %v1281_v12 = vmax.f32 %v1101_v5, 0.0 }
 0x24f   : > { %v1563_v13 = vpack.c.bf16 %v1451_v6, %v1451_v6  ;;  %v1122_v15 = vadd.f32 %v2125_v8, %v2816_v26  ;;  %v1113_v16 = vpop.f32.mrf.mxu1 }
 0x250   : > { %v1458_v17 = vadd.f32 %v1457_v9, %v1456_v2  ;;  %v1463_v18 = vadd.f32 %v1462_v10, %v1375_v7  ;;  %v1332_v20 = vpack.c.bf16 %v1281_v12, %v1280_v14  ;;  %v1114_v29 = vadd.f32 %v2816_v26, %v1113_v16 }
 0x251   : > { %v1618_v19 = vunpack.c.l.b16 %v1563_v13  ;;  %v2126_v22 = vpop.f32.mrf.mxu1  ;;  %v1286_v24 = vmax.f32 %v1122_v15, 0.0  ;;  %v1378_v36 = vunpack.c.l.bf16 %v1333_v11  ;;  %v1379_v43 = vunpack.c.h.bf16 %v1333_v11 }
 0x252   : > { %v1459_v50 = vrot.slane %v1458_v17, 1  ;;  %v1464_v23 = vrot.slane %v1463_v18, 4  ;;  %v1125_v25 = vadd.f32 %v2126_v22, %v2816_v26  ;;  %v1376_v27 = vunpack.c.l.bf16 %v1332_v20 }
 0x253   : > { %v1377_v28 = vunpack.c.h.bf16 %v1332_v20  ;;  %v1116_v30 = vpop.f32.mrf.mxu1  ;;  %v1636_v31 = vsel %vm1635_vm3, %v1618_v19, %v1634_v61  ;;  %v1284_v44 = vmax.f32 %v1114_v29, 0.0 }
 0x254   : > { %v1460_v32 = vadd.f32 %v1459_v50, %v1458_v17  ;;  %v1465_v33 = vadd.f32 %v1464_v23, %v1463_v18  ;;  %v1287_v34 = vmax.f32 %v1125_v25, 0.0  ;;  %v1117_v35 = vadd.f32 %v2816_v26, %v1116_v30 }
 0x255   : > { %v1470_v37 = vadd.f32 %v1377_v28, %v1376_v27  ;;  %v2856_v38 = vpop.f32.mrf.mxu1 }
 0x256   : > { %v1564_v39 = vpack.c.bf16 %v1460_v32, %v1460_v32  ;;  %v1466_v40 = vrot.slane %v1465_v33, 2  ;;  %v1335_v41 = vpack.c.bf16 %v1287_v34, %v1286_v24  ;;  %v1285_v42 = vmax.f32 %v1117_v35, 0.0 }
 0x257   : > { %v1471_v21 = vadd.f32 %v1470_v37, %v1378_v36  ;;  %v1129_v45 = vpop.f32.mrf.mxu1 }
 0x258   : > { %v1619_v46 = vunpack.c.l.b16 %v1564_v39  ;;  %v1467_v47 = vadd.f32 %v1466_v40, %v1465_v33  ;;  %v1334_v49 = vpack.c.bf16 %v1285_v42, %v1284_v44  ;;  %v1382_v60 = vunpack.c.l.bf16 %v1335_v41 }
 0x259   : > { %v1472_v48 = vadd.f32 %v1471_v21, %v1379_v43  ;;  %v2858_v51 = vpop.f32.mrf.mxu1  ;;  %v1383_v1 = vunpack.c.h.bf16 %v1335_v41  ;;  %v1130_v30 = vadd.f32 %v2816_v26, %v1129_v45  ;;  %v1138_v41 = vadd.f32 %v2856_v38, %v2816_v26 }
 0x25a   : > { %v1468_v52 = vrot.slane %v1467_v47, 1  ;;  %v1638_v53 = vsel %vm1637_vm4, %v1619_v46, %v1636_v31  ;;  %v1380_v55 = vunpack.c.l.bf16 %v1334_v49  ;;  %v1381_v56 = vunpack.c.h.bf16 %v1334_v49 }
 0x25b   : > { %v1473_v54 = vrot.slane %v1472_v48, 4  ;;  %v1132_v57 = vpop.f32.mrf.mxu1  ;;  %v1288_v42 = vmax.f32 %v1130_v30, 0.0  ;;  %v1141_v49 = vadd.f32 %v2858_v51, %v2816_v26 }
 0x25c   : > { %v1469_v58 = vadd.f32 %v1468_v52, %v1467_v47  ;;  %v1479_v61 = vadd.f32 %v1381_v56, %v1380_v55  ;;  %v1133_v25 = vadd.f32 %v2816_v26, %v1132_v57  ;;  %v1290_v57 = vmax.f32 %v1138_v41, 0.0 }
 0x25d   : > { %v1474_v59 = vadd.f32 %v1473_v54, %v1472_v48  ;;  %v2133_v62 = vpop.f32.mrf.mxu1  ;;  %v1291_v51 = vmax.f32 %v1141_v49, 0.0 }
 0x25e   : > { %v1565_v63 = vpack.c.bf16 %v1469_v58, %v1469_v58  ;;  %v1480_v2 = vadd.f32 %v1479_v61, %v1382_v60  ;;  %v1289_v34 = vmax.f32 %v1133_v25, 0.0  ;;  %v1154_v45 = vadd.f32 %v2133_v62, %v2816_v26 }
 0x25f   : > { %v1475_v0 = vrot.slane %v1474_v59, 2  ;;  %v1145_v3 = vpop.f32.mrf.mxu1 }
 0x260   : > { %v1620_v4 = vunpack.c.l.b16 %v1565_v63  ;;  %v1481_v6 = vadd.f32 %v1480_v2, %v1383_v1  ;;  %v1146_v32 = vadd.f32 %v2816_v26, %v1145_v3  ;;  %v1336_v52 = vpack.c.bf16 %v1289_v34, %v1288_v42 }
 0x261   : > { %v1476_v5 = vadd.f32 %v1475_v0, %v1474_v59  ;;  %v2134_v7 = vpop.f32.mrf.mxu1  ;;  %v1294_v62 = vmax.f32 %v1154_v45, 0.0 }
 0x262   : > { %v1640_v8 = vsel %vm1639_vm5, %v1620_v4, %v1638_v53  ;;  %v1482_v10 = vrot.slane %v1481_v6, 4  ;;  %v1157_v37 = vadd.f32 %v2134_v7, %v2816_v26  ;;  %v1292_v46 = vmax.f32 %v1146_v32, 0.0 }
 0x263   : > { %v1477_v9 = vrot.slane %v1476_v5, 1  ;;  %v1148_v11 = vpop.f32.mrf.mxu1  ;;  %v1384_v2 = vunpack.c.l.bf16 %v1336_v52  ;;  %v1385_v3 = vunpack.c.h.bf16 %v1336_v52 }
 0x264   : > { %v1483_v13 = vadd.f32 %v1482_v10, %v1481_v6  ;;  %v1149_v28 = vadd.f32 %v2816_v26, %v1148_v11  ;;  %v1295_v54 = vmax.f32 %v1157_v37, 0.0 }
 0x265   : > { %v1478_v12 = vadd.f32 %v1477_v9, %v1476_v5  ;;  %v2137_v14 = vpop.f32.mrf.mxu1 }
 0x266   : > { %v1484_v16 = vrot.slane %v1483_v13, 2  ;;  %v1293_v39 = vmax.f32 %v1149_v28, 0.0  ;;  %v1170_v63 = vadd.f32 %v2137_v14, %v2816_v26  ;;  %v1339_v6 = vpack.c.bf16 %v1295_v54, %v1294_v62 }
 0x267   : > { %v1566_v15 = vpack.c.bf16 %v1478_v12, %v1478_v12  ;;  %v1161_v17 = vpop.f32.mrf.mxu1 }
 0x268   : > { %v1485_v19 = vadd.f32 %v1484_v16, %v1483_v13  ;;  %v1162_v40 = vadd.f32 %v2816_v26, %v1161_v17  ;;  %v1338_v38 = vpack.c.bf16 %v1293_v39, %v1292_v46  ;;  %v1390_v34 = vunpack.c.l.bf16 %v1339_v6 }
 0x269   : > { %v1621_v18 = vunpack.c.l.b16 %v1566_v15  ;;  %v2138_v20 = vpop.f32.mrf.mxu1  ;;  %v1298_v15 = vmax.f32 %v1170_v63, 0.0 }
 0x26a   : > { %v1486_v22 = vrot.slane %v1485_v19, 1  ;;  %v1296_v55 = vmax.f32 %v1162_v40, 0.0  ;;  %v1173_v58 = vadd.f32 %v2138_v20, %v2816_v26  ;;  %v1388_v7 = vunpack.c.l.bf16 %v1338_v38 }
 0x26b   : > { %v1164_v50 = vpop.f32.mrf.mxu1  ;;  %v1642_v23 = vsel %vm1641_vm6, %v1621_v18, %v1640_v8  ;;  %v1389_v10 = vunpack.c.h.bf16 %v1338_v38 }
 0x26c   : > { %v1487_v24 = vadd.f32 %v1486_v22, %v1485_v19  ;;  %v1165_v33 = vadd.f32 %v2816_v26, %v1164_v50  ;;  %v1299_v11 = vmax.f32 %v1173_v58, 0.0 }
 0x26d   : > { %v2141_v27 = vpop.f32.mrf.mxu1  ;;  %v1497_v28 = vadd.f32 %v1389_v10, %v1388_v7 }
 0x26e   : > { %v1567_v29 = vpack.c.bf16 %v1487_v24, %v1487_v24  ;;  %v1297_v47 = vmax.f32 %v1165_v33, 0.0  ;;  %v1186_v1 = vadd.f32 %v2141_v27, %v2816_v26  ;;  %v1337_v24 = vpack.c.bf16 %v1291_v51, %v1290_v57 }
 0x26f   : > { %v1177_v31 = vpop.f32.mrf.mxu1  ;;  %v1488_v33 = vadd.f32 %v1385_v3, %v1384_v2 }
 0x270   : > { %v1622_v36 = vunpack.c.l.b16 %v1567_v29  ;;  %v1178_v43 = vadd.f32 %v2816_v26, %v1177_v31  ;;  %v1340_v0 = vpack.c.bf16 %v1297_v47, %v1296_v55  ;;  %v1302_v17 = vmax.f32 %v1186_v1, 0.0 }
 0x271   : > { %v2142_v35 = vpop.f32.mrf.mxu1  ;;  %v1341_v29 = vpack.c.bf16 %v1299_v11, %v1298_v15  ;;  %v1386_v46 = vunpack.c.l.bf16 %v1337_v24  ;;  %v1498_v47 = vadd.f32 %v1497_v28, %v1390_v34 }
 0x272   : > { %v2874_v44 = vsel %vm1643_vm7, %v1622_v36, %v1642_v23  ;;  %v1300_v59 = vmax.f32 %v1178_v43, 0.0  ;;  %v1189_v60 = vadd.f32 %v2142_v35, %v2816_v26  ;;  %v1392_v16 = vunpack.c.l.bf16 %v1340_v0 }
 0x273   : > { %v1180_v21 = vpop.f32.mrf.mxu1  ;;  %v1393_v19 = vunpack.c.h.bf16 %v1340_v0  ;;  %v1489_v55 = vadd.f32 %v1488_v33, %v1386_v46  ;;  %v1387_v0 = vunpack.c.h.bf16 %v1337_v24  ;;  %v1395_v51 = vunpack.c.h.bf16 %v1341_v29 }
 0x274   : > { %v1181_v48 = vadd.f32 %v2816_v26, %v1180_v21  ;;  %v1303_v12 = vmax.f32 %v1189_v60, 0.0 }
 0x275   : > { %v2145_v53 = vpop.f32.mrf.mxu1  ;;  %v1506_v36 = vadd.f32 %v1393_v19, %v1392_v16 }
 0x276   : > { %v1301_v56 = vmax.f32 %v1181_v48, 0.0  ;;  %v1202_v13 = vadd.f32 %v2145_v53, %v2816_v26  ;;  %v1343_v30 = vpack.c.bf16 %v1303_v12, %v1302_v17  ;;  %v1394_v48 = vunpack.c.l.bf16 %v1341_v29 }
 0x277   : > { %v1193_v61 = vpop.f32.mrf.mxu1 }
 0x278   : > { %v1342_v4 = vpack.c.bf16 %v1301_v56, %v1300_v59  ;;  %v1194_v8 = vadd.f32 %v2816_v26, %v1193_v61  ;;  %v1306_v31 = vmax.f32 %v1202_v13, 0.0  ;;  %v1398_v49 = vunpack.c.l.bf16 %v1343_v30 }
 0x279   : > { %v2146_v5 = vpop.f32.mrf.mxu1  ;;  %v1391_v56 = vunpack.c.h.bf16 %v1339_v6  ;;  %v1507_v57 = vadd.f32 %v1506_v36, %v1394_v48  ;;  %v1399_v3 = vunpack.c.h.bf16 %v1343_v30 }
 0x27a   : > { %v1205_v9 = vadd.f32 %v2146_v5, %v2816_v26  ;;  %v1396_v20 = vunpack.c.l.bf16 %v1342_v4  ;;  %v1397_v22 = vunpack.c.h.bf16 %v1342_v4  ;;  %v1304_v25 = vmax.f32 %v1194_v8, 0.0 }
 0x27b   : > { %v1196_v14 = vpop.f32.mrf.mxu1  ;;  %v1499_v1 = vadd.f32 %v1498_v47, %v1391_v56  ;;  %v1490_v8 = vadd.f32 %v1489_v55, %v1387_v0 }
 0x27c   : > { %v1197_v18 = vadd.f32 %v2816_v26, %v1196_v14  ;;  %v1307_v50 = vmax.f32 %v1205_v9, 0.0  ;;  %v1515_v37 = vadd.f32 %v1397_v22, %v1396_v20  ;;  %v1508_v9 = vadd.f32 %v1507_v57, %v1395_v51 }
 0x27d   : > { %v2149_v23 = vpop.f32.mrf.mxu1  ;;  %v1500_v15 = vrot.slane %v1499_v1, 4 }
 0x27e   : > { %v1305_v27 = vmax.f32 %v1197_v18, 0.0  ;;  %v1345_v39 = vpack.c.bf16 %v1307_v50, %v1306_v31  ;;  %v1218_v40 = vadd.f32 %v2149_v23, %v2816_v26  ;;  %v1516_v58 = vadd.f32 %v1515_v37, %v1398_v49 }
 0x27f   : > { %v1209_v32 = vpop.f32.mrf.mxu1  ;;  %v1491_v23 = vrot.slane %v1490_v8, 4  ;;  %v1509_v24 = vrot.slane %v1508_v9, 4 }
 0x280   : > { %v1344_v35 = vpack.c.bf16 %v1305_v27, %v1304_v25  ;;  %v1210_v21 = vadd.f32 %v2816_v26, %v1209_v32  ;;  %v1402_v60 = vunpack.c.l.bf16 %v1345_v39  ;;  %v1310_v61 = vmax.f32 %v1218_v40, 0.0 }
 0x281   : > { %v2150_v41 = vpop.f32.mrf.mxu1  ;;  %v1403_v10 = vunpack.c.h.bf16 %v1345_v39  ;;  %v1517_v6 = vadd.f32 %v1516_v58, %v1399_v3  ;;  %v1492_v39 = vadd.f32 %v1491_v23, %v1490_v8 }
 0x282   : > { %v1400_v42 = vunpack.c.l.bf16 %v1344_v35  ;;  %v1401_v43 = vunpack.c.h.bf16 %v1344_v35  ;;  %v1221_v45 = vadd.f32 %v2150_v41, %v2816_v26  ;;  %v1308_v62 = vmax.f32 %v1210_v21, 0.0 }
 0x283   : > { %v1212_v52 = vpop.f32.mrf.mxu1  ;;  %v1518_v28 = vrot.slane %v1517_v6, 4  ;;  %v1501_v35 = vadd.f32 %v1500_v15, %v1499_v1 }
 0x284   : > { %v1524_v53 = vadd.f32 %v1401_v43, %v1400_v42  ;;  %v1311_v54 = vmax.f32 %v1221_v45, 0.0  ;;  %v1213_v38 = vadd.f32 %v2816_v26, %v1212_v52  ;;  %v1510_v43 = vadd.f32 %v1509_v24, %v1508_v9 }
 0x285   : > { %v2153_v59 = vpop.f32.mrf.mxu1  ;;  %v1519_v21 = vadd.f32 %v1518_v28, %v1517_v6 }
 0x286   : > { %v1309_v63 = vmax.f32 %v1213_v38, 0.0  ;;  %v1525_v4 = vadd.f32 %v1524_v53, %v1402_v60  ;;  %v1347_v5 = vpack.c.bf16 %v1311_v54, %v1310_v61  ;;  %v1234_v16 = vadd.f32 %v2153_v59, %v2816_v26 }
 0x287   : > { %v1225_v2 = vpop.f32.mrf.mxu1  ;;  %v1502_v54 = vrot.slane %v1501_v35, 2  ;;  %v1493_v60 = vrot.slane %v1492_v39, 2  ;;  %v1511_v61 = vrot.slane %v1510_v43, 2 }
 0x288   : > { %v1346_v7 = vpack.c.bf16 %v1309_v63, %v1308_v62  ;;  %v1226_v17 = vadd.f32 %v2816_v26, %v1225_v2  ;;  %v1526_v19 = vadd.f32 %v1525_v4, %v1403_v10  ;;  %v1406_v20 = vunpack.c.l.bf16 %v1347_v5 }
 0x289   : > { %v2154_v11 = vpop.f32.mrf.mxu1  ;;  %v1407_v29 = vunpack.c.h.bf16 %v1347_v5  ;;  %v1314_v32 = vmax.f32 %v1234_v16, 0.0  ;;  %v1520_v62 = vrot.slane %v1519_v21, 2  ;;  %v1503_v3 = vadd.f32 %v1502_v54, %v1501_v35 }
 0x28a   : > { %v1404_v12 = vunpack.c.l.bf16 %v1346_v7  ;;  %v1405_v13 = vunpack.c.h.bf16 %v1346_v7  ;;  %v1237_v14 = vadd.f32 %v2154_v11, %v2816_v26  ;;  %v1312_v33 = vmax.f32 %v1226_v17, 0.0 }
 0x28b   : > { %v1228_v18 = vpop.f32.mrf.mxu1  ;;  %v1527_v36 = vrot.slane %v1526_v19, 4  ;;  %v1494_v10 = vadd.f32 %v1493_v60, %v1492_v39  ;;  %v1521_v11 = vadd.f32 %v1520_v62, %v1519_v21 }
 0x28c   : > { %v1533_v22 = vadd.f32 %v1405_v13, %v1404_v12  ;;  %v1229_v50 = vadd.f32 %v2816_v26, %v1228_v18  ;;  %v1315_v25 = vmax.f32 %v1237_v14, 0.0  ;;  %v1504_v14 = vrot.slane %v1503_v3, 1 }
 0x28d   : > { %v2157_v27 = vpop.f32.mrf.mxu1  ;;  %v1528_v38 = vadd.f32 %v1527_v36, %v1526_v19 }
 0x28e   : > { %v1534_v30 = vadd.f32 %v1533_v22, %v1406_v20  ;;  %v1313_v31 = vmax.f32 %v1229_v50, 0.0  ;;  %v1349_v40 = vpack.c.bf16 %v1315_v25, %v1314_v32  ;;  %v1250_v49 = vadd.f32 %v2157_v27, %v2816_v26 }
 0x28f   : > { %v1241_v34 = vpop.f32.mrf.mxu1  ;;  %v1529_v4 = vrot.slane %v1528_v38, 2  ;;  %v1495_v20 = vrot.slane %v1494_v10, 1  ;;  %v1522_v50 = vrot.slane %v1521_v11, 1  ;;  %v1505_v28 = vadd.f32 %v1504_v14, %v1503_v3 }
 0x290   : > { %v1535_v37 = vadd.f32 %v1534_v30, %v1407_v29  ;;  %v1348_v41 = vpack.c.bf16 %v1313_v31, %v1312_v33  ;;  %v1242_v52 = vadd.f32 %v2816_v26, %v1241_v34  ;;  %v1410_v57 = vunpack.c.l.bf16 %v1349_v40 }
 0x291   : > { %v2158_v42 = vpop.f32.mrf.mxu1  ;;  %v1411_v0 = vunpack.c.h.bf16 %v1349_v40  ;;  %v1318_v51 = vmax.f32 %v1250_v49, 0.0  ;;  %v1530_v15 = vadd.f32 %v1529_v4, %v1528_v38  ;;  %v1496_v33 = vadd.f32 %v1495_v20, %v1494_v10 }
 0x292   : > { %v1536_v45 = vrot.slane %v1535_v37, 4  ;;  %v1253_v46 = vadd.f32 %v2158_v42, %v2816_v26  ;;  %v1408_v47 = vunpack.c.l.bf16 %v1348_v41  ;;  %v1409_v48 = vunpack.c.h.bf16 %v1348_v41 }
 0x293   : > { %v1244_v53 = vpop.f32.mrf.mxu1  ;;  %v1316_v2 = vmax.f32 %v1242_v52, 0.0  ;;  %v1531_v27 = vrot.slane %v1530_v15, 1  ;;  %v1523_v34 = vadd.f32 %v1522_v50, %v1521_v11  ;;  %v1569_v39 = vpack.c.bf16 %v1505_v28, %v1505_v28 }
 0x294   : > { %v1245_v55 = vadd.f32 %v2816_v26, %v1244_v53  ;;  %v1537_v56 = vadd.f32 %v1536_v45, %v1535_v37  ;;  %v1542_v58 = vadd.f32 %v1409_v48, %v1408_v47  ;;  %v1319_v59 = vmax.f32 %v1253_v46, 0.0 }
 0x295   : > { %v1512_v26 = vadd.f32 %v1511_v61, %v1510_v43  ;;  %v1532_v37 = vadd.f32 %v1531_v27, %v1530_v15  ;;  %v1568_v21 = vpack.c.bf16 %v1496_v33, %v1496_v33  ;;  %v1571_v45 = vpack.c.bf16 %v1523_v34, %v1523_v34 }
 0x296   : > { %v1317_v63 = vmax.f32 %v1245_v55, 0.0  ;;  %v1543_v1 = vadd.f32 %v1542_v58, %v1410_v57  ;;  %v1538_v5 = vrot.slane %v1537_v56, 2  ;;  %v1351_v8 = vpack.c.bf16 %v1319_v59, %v1318_v51 }
 0x297   : > { %v1513_v22 = vrot.slane %v1512_v26, 1  ;;  %v1572_v47 = vpack.c.bf16 %v1532_v37, %v1532_v37  ;;  %v1624_v48 = vunpack.c.l.b16 %v1569_v39  ;;  %v1623_v38 = vunpack.c.l.b16 %v1568_v21 }
 0x298   : > { %v1544_v7 = vadd.f32 %v1543_v1, %v1411_v0  ;;  %v1350_v9 = vpack.c.bf16 %v1317_v63, %v1316_v2  ;;  %v1539_v16 = vadd.f32 %v1538_v5, %v1537_v56  ;;  %v1414_v18 = vunpack.c.l.bf16 %v1351_v8 }
 0x299   : > { %v1415_v24 = vunpack.c.h.bf16 %v1351_v8  ;;  %v1514_v32 = vadd.f32 %v1513_v22, %v1512_v26  ;;  %v1626_v55 = vunpack.c.l.b16 %v1571_v45  ;;  %v1627_v57 = vunpack.c.l.b16 %v1572_v47 }
 0x29a   : > { %v1545_v6 = vrot.slane %v1544_v7, 4  ;;  %v1412_v12 = vunpack.c.l.bf16 %v1350_v9  ;;  %v1413_v13 = vunpack.c.h.bf16 %v1350_v9  ;;  %v1540_v29 = vrot.slane %v1539_v16, 1 }
 0x29b   : > { %v1570_v42 = vpack.c.bf16 %v1514_v32, %v1514_v32  ;;  %v1645_v58 = vsel %vm1631_vm1, %v1624_v48, %v1623_v38 }
 0x29c   : > { %v1546_v17 = vadd.f32 %v1545_v6, %v1544_v7  ;;  %v1551_v19 = vadd.f32 %v1413_v13, %v1412_v12  ;;  %v1541_v40 = vadd.f32 %v1540_v29, %v1539_v16  ;;  %v1894_v7 = vld [vmem:[%s2967_s6] ss:$0 sm:$0xff] }
 0x29d   : > { %v1625_v53 = vunpack.c.l.b16 %v1570_v42 }
 0x29e   : > { %v1547_v23 = vrot.slane %v1546_v17, 2  ;;  %v1552_v25 = vadd.f32 %v1551_v19, %v1414_v18  ;;  %v1573_v49 = vpack.c.bf16 %v1541_v40, %v1541_v40 }
 0x29f   : > { %v1646_v61 = vsel %vm1633_vm2, %v1625_v53, %v1645_v58 }
 0x2a0   : > { %v1548_v30 = vadd.f32 %v1547_v23, %v1546_v17  ;;  %v1553_v31 = vadd.f32 %v1552_v25, %v1415_v24  ;;  %v1628_v59 = vunpack.c.l.b16 %v1573_v49  ;;  %v1647_v0 = vsel %vm1635_vm3, %v1626_v55, %v1646_v61 }
 0x2a1   : > { %v1648_v1 = vsel %vm1637_vm4, %v1627_v57, %v1647_v0 }
 0x2a2   : > { %v1549_v35 = vrot.slane %v1548_v30, 1  ;;  %v1554_v36 = vrot.slane %v1553_v31, 4  ;;  %v1649_v2 = vsel %vm1639_vm5, %v1628_v59, %v1648_v1 }
 0x2a4   : > { %v1555_v41 = vadd.f32 %v1554_v36, %v1553_v31  ;;  %v1550_v43 = vadd.f32 %v1549_v35, %v1548_v30 }
 0x2a6   : > { %v1556_v46 = vrot.slane %v1555_v41, 2  ;;  %v1574_v54 = vpack.c.bf16 %v1550_v43, %v1550_v43 }
 0x2a8   : > { %v1557_v52 = vadd.f32 %v1556_v46, %v1555_v41  ;;  %v1629_v62 = vunpack.c.l.b16 %v1574_v54 }
 0x2aa   : > { %v1558_v56 = vrot.slane %v1557_v52, 1  ;;  %v1650_v3 = vsel %vm1641_vm6, %v1629_v62, %v1649_v2 }
 0x2ac   : > { %v1559_v60 = vadd.f32 %v1558_v56, %v1557_v52 }
 0x2ae   : > { %v1575_v63 = vpack.c.bf16 %v1559_v60, %v1559_v60 }
 0x2b0   : > { %v1630_v51 = vunpack.c.l.b16 %v1575_v63 }
 0x2b2   : > { %v1651_v4 = vsel %vm1643_vm7, %v1630_v51, %v1650_v3 }
 0x2b3   : > { %v1652_v5 = vpack.c.b16 %v1651_v4, %v2874_v44 }
 0x2b5   : > { %2176 = vmatmul.mubr.bf16.vlgmr.msra.gmra.mxu0 %v1652_v5 }
 0x375   : > { %v1736_v8 = vpop.f32.mrf.mxu0 }
 0x376   : > { %v1737_v9 = vadd.f32 %v1894_v7, %v1736_v8 }
 0x377   : > { %v2177_v10 = vpop.f32.mrf.mxu0 }
 0x378   : > { %1743 = vst [vmem:[%s340_s29] sm:$0xff] %v1737_v9 }
 0x379   : > { %v1739_v44 = vpop.f32.mrf.mxu0 }
 0x37a   : > { %v1740_v26 = vadd.f32 %v1894_v7, %v1739_v44 }
 0x37b   : > { %v2178_v11 = vpop.f32.mrf.mxu0 }
 0x37c   : > { %1744 = vst [vmem:[%s340_s29 + $0x8] sm:$0xff] %v1740_v26 }
 0x37d   : > { %2407 = shalt.err (!%p2404_p9)
}
 0x37e   : > { %s2408_s10 = scalar_lea.hbm %s2918_s18, 256  ;;  %s2412_s21 = scalar_lea.hbm %s2968_s7, 512 }
 0x37f   : > { %p2409_p1 = scmp.ne.s32.totalorder %s2918_s18, %s2408_s10  ;;  %p2413_p11 = scmp.lt.s32.totalorder %s2918_s18, %s2968_s7 }
 0x380   : > { %p2414_p13 = scmp.lt.s32.totalorder %s2412_s21, %s2408_s10 }
 0x381   : > { %p2410_p8 = pnand %p2409_p1, %p2988_p6 }
 0x382   : > { %p2415_p2 = por %p2414_p13, %p2413_p11 }
 0x383   : > { %p2411_p10 = pneg %p2410_p8 }
 0x385   : > { %p2416_p4 = pnand %p2415_p2, %p2411_p10 }
 0x387   : > { %2419 = shalt.err (!%p2416_p4)
}
 0x388   : > { %s2479_s22 = smov 128   ;;  %s2480_s1 = smov 8  }
 0x389   : > { %2193 = dma.vmem_to_hbm [thread:$0]  (%p2988_p6), %s2913_s12, 256, %s2918_s18, %s1746_s19, %s2479_s22, %s2479_s22, %s2480_s1  }
 0x38a PF: > { %s1774_s30 = sand.u32 1, %s2454_s24   ;;  %p2989_p12 = scmp.ne.s32.totalorder %s2975_s8, 0 }
 0x38b   : > { %p2990_p0 = scmp.ge.s32.totalorder %s2466_s27, 2  ;;  %s1775_s28 = scalar_lea.sflag [#allocation4], %s1774_s30 }
 0x38d   : > { %p2210_p5 = pnand %p2990_p0, %p2989_p12 }
 0x38f   : > { %p2211_p3 = pneg %p2210_p5 }
 0x391   : > { %2449 = dma.done.wait (%p2211_p3), %s1775_s28, 256  }
 0x392   : > { %2451 = vsyncadd (%p2211_p3), %s1775_s28, 4294967040  ;;  %p22_p7 = scmp.ge.s32.totalorder %s2601_s14, 4   ;;  %s2991_s24 = smov %s2458_s25 }
 0x393   : > { %s2992_s25 = smov %s2462_s26  ;;  %s2993_s26 = smov %s2611_s17 }
 0x394   : > { %s2994_s27 = smov %s2601_s14  ;;  %24 = sbr.rel (!%p22_p7) target bundleno = 9 (0x9), region = 105 }
 0x399   :  { %1780 = vsyncpa [#allocation3], 1 }
 0x39a   :  { %1782 = vsyncpa [#allocation3 + $0x1], 1 }
 0x39b   :  { %1783 = vsyncpa [#allocation6], 1 }
 0x39c   :  { %1784 = vsyncpa [#allocation9], 1 }
 0x39d   :  { %1785 = vsyncpa [#allocation4], 1 }
 0x39e   :  { %1787 = vsyncpa [#allocation4 + $0x1], 1 }

</bundles_post_ra>
